<compile_context>
chip_gen: v5e
topology: v5e:2x2
jax: 0.10.0
libtpu: 0.0.40
codegen_flags: <defaults>
</compile_context>

<pallas_src>
import jax
import jax.numpy as jnp
from jax.experimental import pallas as pl
from jax.experimental.pallas import tpu as pltpu


# ----------------------------------------------------------------------------- helpers

def _round_up(x, m):
    return ((x + m - 1) // m) * m


def _vmem_capacity_bytes():
    """Physical VMEM per TensorCore; falls back to 128 MiB if the query fails."""
    try:
        info = pltpu.get_tpu_info()
        cap = getattr(info, "vmem_capacity_bytes", None)
        if cap:
            return int(cap)
    except Exception:  # pragma: no cover - e.g. interpret mode / non-TPU host
        pass
    return 128 << 20


def _pick_ti(I, ti_target):
    """Pick an intermediate tile (multiple of 128) and the padded intermediate size."""
    ti_target = max(128, (ti_target // 128) * 128)
    # Prefer a 128-multiple that divides I exactly (no weight padding needed).
    start = min(ti_target, (I // 128) * 128)
    t = start
    while t >= 128:
        if I % t == 0:
            return t, I
        t -= 128
    # Otherwise pad I up so a 128-multiple tile divides it.
    t = min(ti_target, _round_up(I, 128))
    return t, _round_up(I, t)


def _tile_footprint(tm, ti, H, esize, wsize, osize, use_scratch):
    """Approximate VMEM bytes for one grid step (inputs double-buffered)."""
    b = 2 * tm * H * esize          # x tile (double-buffered)
    b += 2 * 2 * H * ti * wsize     # gate + up weight tiles (double-buffered each)
    b += 2 * ti * H * wsize         # down-proj weight tile (double-buffered)
    b += 2 * tm * H * osize         # output tile (double-buffered)
    b += 3 * tm * ti * 4            # f32 intermediates: gate, up, h
    if use_scratch:
        b += tm * H * 4             # f32 accumulator scratch
    return b


# ----------------------------------------------------------------------------- kernels

def _phi3_mlp_kernel_scratch(x_ref, w_gate_ref, w_up_ref, w_down_ref, o_ref, acc_ref):
    """Variant with an f32 VMEM accumulator (used when the output dtype is not f32)."""
    j = pl.program_id(1)

    @pl.when(j == 0)
    def _():
        acc_ref[...] = jnp.zeros_like(acc_ref)

    x = x_ref[...]
    gate = jnp.dot(x, w_gate_ref[...], preferred_element_type=jnp.float32)
    up = jnp.dot(x, w_up_ref[...], preferred_element_type=jnp.float32)
    # activation_fn = SiLU (config.hidden_act == "silu" for Phi-3), applied in f32.
    h = up * (gate * jax.nn.sigmoid(gate))
    acc_ref[...] += jnp.dot(h.astype(w_down_ref.dtype), w_down_ref[...],
                            preferred_element_type=jnp.float32)

    @pl.when(j == pl.num_programs(1) - 1)
    def _():
        o_ref[...] = acc_ref[...].astype(o_ref.dtype)


def _phi3_mlp_kernel_inplace(x_ref, w_gate_ref, w_up_ref, w_down_ref, o_ref):
    """f32-output variant: accumulate directly into the resident output tile."""
    j = pl.program_id(1)

    @pl.when(j == 0)
    def _():
        o_ref[...] = jnp.zeros_like(o_ref)

    x = x_ref[...]
    gate = jnp.dot(x, w_gate_ref[...], preferred_element_type=jnp.float32)
    up = jnp.dot(x, w_up_ref[...], preferred_element_type=jnp.float32)
    h = up * (gate * jax.nn.sigmoid(gate))
    o_ref[...] += jnp.dot(h.astype(w_down_ref.dtype), w_down_ref[...],
                          preferred_element_type=jnp.float32)


# ----------------------------------------------------------------------------- wrapper

def phi3_mlp(hidden_states, w_gate_up, w_down, *, tm=None, ti=None):
    """Fused Phi-3 MLP.

    hidden_states: [..., H]; w_gate_up: [H, 2*I] ([in, out] layout, gate | up);
    w_down: [I, H].  No biases (matches the module).
    """
    orig_shape = hidden_states.shape
    H = orig_shape[-1]
    I = w_down.shape[0]
    assert w_gate_up.shape == (H, 2 * I), (w_gate_up.shape, H, I)
    assert w_down.shape == (I, H)

    x = hidden_states.reshape(-1, H)
    M = x.shape[0]

    esize = jnp.dtype(hidden_states.dtype).itemsize
    wsize = jnp.dtype(w_gate_up.dtype).itemsize
    osize = esize
    out_is_f32 = jnp.dtype(hidden_states.dtype) == jnp.dtype(jnp.float32)
    use_scratch = not out_is_f32

    # dtype-dependent sublane multiple (f32:8, bf16:16, int8/fp8:32).
    sub = 8 * max(1, 4 // esize)

    # ---- generation-aware defaults -------------------------------------------------
    vmem_cap = _vmem_capacity_bytes()
    budget = int(vmem_cap * 0.8)               # leave headroom for compiler scratch
    small_vmem = vmem_cap <= (80 << 20)        # v7x-like: 64 MiB/TC, 2 TensorCores
    if ti is None:
        ti = 256 if small_vmem else 512
    if tm is None:
        tm = 512 if small_vmem else 1024

    # ---- intermediate tile / padding ------------------------------------------------
    ti_eff, Ip = _pick_ti(I, ti)
    if Ip != I:
        # Pad the intermediate dimension with zero columns/rows (safe: no bias,
        # padded h is exactly zero and padded down rows are zero).
        gate_w = jnp.pad(w_gate_up[:, :I], ((0, 0), (0, Ip - I)))
        up_w = jnp.pad(w_gate_up[:, I:], ((0, 0), (0, Ip - I)))
        w_gate_up = jnp.concatenate([gate_w, up_w], axis=1)
        w_down = jnp.pad(w_down, ((0, Ip - I), (0, 0)))
    n_i = Ip // ti_eff

    # ---- token tile -----------------------------------------------------------------
    tm_eff = min(tm, _round_up(M, sub))
    if small_vmem and M >= 2 * sub:
        # Keep >= 2 token blocks so the "parallel" axis feeds both v7x TensorCores.
        tm_eff = min(tm_eff, _round_up(-(-M // 2), sub))
    tm_eff = max(sub, _round_up(tm_eff, sub))
    while tm_eff > sub and _tile_footprint(tm_eff, ti_eff, H, esize, wsize, osize,
                                           use_scratch) > budget:
        tm_eff = max(sub, _round_up(tm_eff // 2, sub))

    Mp = _round_up(M, tm_eff)
    if Mp != M:
        x = jnp.pad(x, ((0, Mp - M), (0, 0)))  # zero rows stay zero (no bias)

    # ---- VMEM limit & cost hint -----------------------------------------------------
    vmem_limit = max(32 << 20, min(budget, vmem_cap - (4 << 20)))
    cost = pl.CostEstimate(
        flops=6 * M * H * I,
        transcendentals=M * I,
        bytes_accessed=(2 * H * I + I * H) * wsize + 2 * M * H * esize,
    )

    kernel = _phi3_mlp_kernel_inplace if out_is_f32 else _phi3_mlp_kernel_scratch
    scratch_shapes = [] if out_is_f32 else [pltpu.VMEM((tm_eff, H), jnp.float32)]

    out = pl.pallas_call(
        kernel,
        out_shape=jax.ShapeDtypeStruct((Mp, H), hidden_states.dtype),
        grid_spec=pltpu.PrefetchScalarGridSpec(
            num_scalar_prefetch=0,
            grid=(Mp // tm_eff, n_i),
            in_specs=[
                # activations tile (resident across the streamed I axis)
                pl.BlockSpec((tm_eff, H), lambda i, j: (i, 0)),
                # gate half of gate_up: column blocks 0 .. n_i-1
                pl.BlockSpec((H, ti_eff), lambda i, j: (0, j)),
                # up half of gate_up: column blocks n_i .. 2*n_i-1 (same array)
                pl.BlockSpec((H, ti_eff), lambda i, j, n=n_i: (0, j + n)),
                # down-proj rows matching the current intermediate tile
                pl.BlockSpec((ti_eff, H), lambda i, j: (j, 0)),
            ],
            out_specs=pl.BlockSpec((tm_eff, H), lambda i, j: (i, 0)),
            scratch_shapes=scratch_shapes,
        ),
        compiler_params=pltpu.CompilerParams(
            dimension_semantics=("parallel", "arbitrary"),
            vmem_limit_bytes=int(vmem_limit),
        ),
        cost_estimate=cost,
    )(x, w_gate_up, w_gate_up, w_down)

    if Mp != M:
        out = out[:M]
    return out.reshape(orig_shape)


# ----------------------------------------------------------------------------- reference

def phi3_mlp_reference(hidden_states, w_gate_up, w_down):
    I = w_down.shape[0]
    gu = jnp.dot(hidden_states, w_gate_up)
    gate, up = gu[..., :I], gu[..., I:]
    h = up * jax.nn.silu(gate)
    return jnp.dot(h, w_down)


if __name__ == "__main__":
    # Small, lane-aligned config consistent with the module.
    batch, seq, hidden_size, intermediate_size = 2, 8, 256, 512

    key = jax.random.PRNGKey(0)
    kx, kgu, kd = jax.random.split(key, 3)

    x = jax.random.normal(kx, (batch, seq, hidden_size), dtype=jnp.float32)
    # Weights stored as [in, out] (transposed nn.Linear weight), no bias.
    w_gate_up = jax.random.normal(
        kgu, (hidden_size, 2 * intermediate_size), dtype=jnp.float32) * 0.05
    w_down = jax.random.normal(
        kd, (intermediate_size, hidden_size), dtype=jnp.float32) * 0.05

    out = phi3_mlp(x, w_gate_up, w_down)
    out = jax.block_until_ready(out)

    ref = phi3_mlp_reference(x, w_gate_up, w_down)
    assert out.shape == x.shape
    assert jnp.allclose(out, ref, atol=2e-3, rtol=2e-3), "mismatch vs reference"

    print("KERNEL_OK")
</pallas_src>

<mosaic_0001>
module attributes {stable_mosaic.version = 11 : i64} {
  func.func @_phi3_mlp_kernel_inplace(%arg0: i32, %arg1: i32, %arg2: memref<16x256xf32, #tpu.memory_space<vmem>>, %arg3: memref<256x512xf32, #tpu.memory_space<vmem>>, %arg4: memref<256x512xf32, #tpu.memory_space<vmem>>, %arg5: memref<512x256xf32, #tpu.memory_space<vmem>>, %arg6: memref<16x256xf32, #tpu.memory_space<vmem>>) attributes {dimension_semantics = [#tpu.dimension_semantics<parallel>, #tpu.dimension_semantics<arbitrary>], iteration_bounds = array<i64: 1, 1>, scalar_prefetch = 0 : i64, scratch_operands = 0 : i64, tpu.core_type = #tpu.core_type<tc>, window_params = [{transform_indices = @transform_0, window_bounds = array<i64: 16, 256>}, {transform_indices = @transform_1, window_bounds = array<i64: 256, 512>}, {transform_indices = @transform_2, window_bounds = array<i64: 256, 512>}, {transform_indices = @transform_3, window_bounds = array<i64: 512, 256>}, {transform_indices = @transform_4, window_bounds = array<i64: 16, 256>}]} {
    %c0_i32 = arith.constant 0 : i32
    %0 = arith.cmpi eq, %arg1, %c0_i32 : i32
    %1 = arith.extui %0 : i1 to i32
    %c0_i32_0 = arith.constant 0 : i32
    %2 = arith.cmpi ne, %1, %c0_i32_0 : i32
    scf.if %2 {
      %cst_15 = arith.constant 0.000000e+00 : f32
      %20 = vector.broadcast %cst_15 : f32 to vector<16x256xf32>
      %c0_16 = arith.constant 0 : index
      %c0_17 = arith.constant 0 : index
      %21 = vector.load %arg6[%c0_16, %c0_17] : memref<16x256xf32, #tpu.memory_space<vmem>>, vector<16x256xf32>
      tpu.vector_store %arg6[%c0_16, %c0_17], %20 {strides = array<i32>} : memref<16x256xf32, #tpu.memory_space<vmem>>, vector<16x256xf32>,
    } else {
    }
    %c0 = arith.constant 0 : index
    %c0_1 = arith.constant 0 : index
    %3 = vector.load %arg2[%c0, %c0_1] : memref<16x256xf32, #tpu.memory_space<vmem>>, vector<16x256xf32>
    %c0_2 = arith.constant 0 : index
    %c0_3 = arith.constant 0 : index
    %4 = vector.load %arg3[%c0_2, %c0_3] : memref<256x512xf32, #tpu.memory_space<vmem>>, vector<256x512xf32>
    %cst = arith.constant dense<0.000000e+00> : vector<16x512xf32>
    %5 = tpu.matmul %3, %4, %cst {dimension_numbers = #tpu.dot_dimension_numbers<[1], [0], [0], [1], [0, 0, 1, 1], [], []>} : vector<16x256xf32>, vector<256x512xf32>, vector<16x512xf32> -> vector<16x512xf32>
    %c0_4 = arith.constant 0 : index
    %c0_5 = arith.constant 0 : index
    %6 = vector.load %arg4[%c0_4, %c0_5] : memref<256x512xf32, #tpu.memory_space<vmem>>, vector<256x512xf32>
    %cst_6 = arith.constant dense<0.000000e+00> : vector<16x512xf32>
    %7 = tpu.matmul %3, %6, %cst_6 {dimension_numbers = #tpu.dot_dimension_numbers<[1], [0], [0], [1], [0, 0, 1, 1], [], []>} : vector<16x256xf32>, vector<256x512xf32>, vector<16x512xf32> -> vector<16x512xf32>
    %8 = arith.negf %5 : vector<16x512xf32>
    %9 = math.exp %8 : vector<16x512xf32>
    %cst_7 = arith.constant 1.000000e+00 : f32
    %10 = vector.broadcast %cst_7 : f32 to vector<16x512xf32>
    %11 = arith.addf %10, %9 : vector<16x512xf32>
    %12 = arith.divf %10, %11 : vector<16x512xf32>
    %13 = arith.mulf %5, %12 : vector<16x512xf32>
    %14 = arith.mulf %7, %13 : vector<16x512xf32>
    %c0_8 = arith.constant 0 : index
    %c0_9 = arith.constant 0 : index
    %15 = vector.load %arg6[%c0_8, %c0_9] : memref<16x256xf32, #tpu.memory_space<vmem>>, vector<16x256xf32>
    %c0_10 = arith.constant 0 : index
    %c0_11 = arith.constant 0 : index
    %16 = vector.load %arg5[%c0_10, %c0_11] : memref<512x256xf32, #tpu.memory_space<vmem>>, vector<512x256xf32>
    %cst_12 = arith.constant dense<0.000000e+00> : vector<16x256xf32>
    %17 = tpu.matmul %14, %16, %cst_12 {dimension_numbers = #tpu.dot_dimension_numbers<[1], [0], [0], [1], [0, 0, 1, 1], [], []>} : vector<16x512xf32>, vector<512x256xf32>, vector<16x256xf32> -> vector<16x256xf32>
    %18 = arith.addf %15, %17 : vector<16x256xf32>
    %c0_13 = arith.constant 0 : index
    %c0_14 = arith.constant 0 : index
    %19 = vector.load %arg6[%c0_13, %c0_14] : memref<16x256xf32, #tpu.memory_space<vmem>>, vector<16x256xf32>
    tpu.vector_store %arg6[%c0_13, %c0_14], %18 {strides = array<i32>} : memref<16x256xf32, #tpu.memory_space<vmem>>, vector<16x256xf32>,
    return
  }
  func.func @transform_0(%arg0: i32, %arg1: i32) -> (i32, i32) {
    %c0_i32 = arith.constant 0 : i32
    %c0_i32_0 = arith.constant 0 : i32
    return %arg0, %c0_i32 : i32, i32
  }
  func.func @transform_1(%arg0: i32, %arg1: i32) -> (i32, i32) {
    %c0_i32 = arith.constant 0 : i32
    %c0_i32_0 = arith.constant 0 : i32
    return %c0_i32, %arg1 : i32, i32
  }
  func.func @transform_2(%arg0: i32, %arg1: i32) -> (i32, i32) {
    %c1_i32 = arith.constant 1 : i32
    %0 = arith.addi %arg1, %c1_i32 : i32
    %c0_i32 = arith.constant 0 : i32
    %c0_i32_0 = arith.constant 0 : i32
    return %c0_i32, %0 : i32, i32
  }
  func.func @transform_3(%arg0: i32, %arg1: i32) -> (i32, i32) {
    %c0_i32 = arith.constant 0 : i32
    %c0_i32_0 = arith.constant 0 : i32
    return %arg1, %c0_i32 : i32, i32
  }
  func.func @transform_4(%arg0: i32, %arg1: i32) -> (i32, i32) {
    %c0_i32 = arith.constant 0 : i32
    %c0_i32_0 = arith.constant 0 : i32
    return %arg0, %c0_i32 : i32, i32
  }
}

</mosaic_0001>

<bundles_post_ra>
// kernel: tpu_custom_call.1
= control target key start
LH: loop header
LB: loop body
LE: loop exit
PB: predicated region body
PF: predicated region fallthrough
CT: control target
= control target key end

     0   :  { %9 = vsyncpa [#allocation3], 0  ;;  %s1757_s0 = inlined_call_operand.hbm [shape: f32[16,256], index: 0, kind: input, shape index: {}]   ;;  %s1758_s1 = inlined_call_operand.hbm [shape: f32[256,1024], index: 1, kind: input, shape index: {}]   ;;  %s1759_s2 = inlined_call_operand.hbm [shape: f32[256,1024], index: 2, kind: input, shape index: {}]   ;;  %s1760_s3 = inlined_call_operand.hbm [shape: f32[512,256], index: 3, kind: input, shape index: {}]   ;;  %s1761_s4 = inlined_call_operand.hbm [shape: f32[16,256], index: 4, kind: output, shape index: {}]  }
   0x1   :  { %10 = vsyncpa [#allocation6], 0 }
   0x2   :  { %11 = vsyncpa [#allocation9], 0  ;;  %s30_s17 = sshll.u32 %s1758_s1, 4  ;;  %s31_s17 = int_to_ptr.hbm [resolvable:$true] %s30_s17 }
   0x3   :  { %12 = vsyncpa [#allocation4], 0  ;;  %s1416_s18 = smov [#allocation5]   ;;  %s1417_s20 = smov 1024  }
   0x4   :  { %s32_s19 = sshll.u32 %s1416_s18, 4  ;;  %s1418_s21 = smov 512   ;;  %s33_s19 = int_to_ptr.vmem [resolvable:$true] %s32_s19 }
   0x5   :  { %s1419_s22 = smov 32   ;;  %s17_s25 = sshll.u32 %s1757_s0, 4  ;;  %s18_s25 = int_to_ptr.hbm [resolvable:$true] %s17_s25 }
   0x6   :  { %38 = dma.hbm_to_vmem [thread:$0]  %s31_s17, 16384, %s33_s19, [#allocation6], %s1417_s20, %s1418_s21, %s1419_s22  }
   0x7   :  { %s1420_s26 = smov [#allocation2]   ;;  %s1236_s1 = scalar_lea.hbm %s1759_s2, 32 }
   0x8   :  { %s19_s27 = sshll.u32 %s1420_s26, 4  ;;  %s1421_s30 = smov 256   ;;  %s20_s27 = int_to_ptr.vmem [resolvable:$true] %s19_s27 }
   0x9   :  { %s1422_s5 = smov 16   ;;  %s47_s6 = sshll.u32 %s1236_s1, 4  ;;  %s48_s6 = int_to_ptr.hbm [resolvable:$true] %s47_s6 }
   0xa   :  { %25 = dma.hbm_to_vmem [thread:$0]  %s18_s25, 512, %s20_s27, [#allocation3], %s1421_s30, %s1421_s30, %s1422_s5  }
   0xb   :  { %s1423_s7 = smov [#allocation7]   ;;  %s60_s10 = sshll.u32 %s1760_s3, 4  ;;  %s61_s10 = int_to_ptr.hbm [resolvable:$true] %s60_s10 }
   0xc   :  { %s49_s8 = sshll.u32 %s1423_s7, 4  ;;  %s1424_s11 = smov [#allocation8]   ;;  %s50_s8 = int_to_ptr.vmem [resolvable:$true] %s49_s8 }
   0xd   :  { %55 = dma.hbm_to_vmem [thread:$0]  %s48_s6, 16384, %s50_s8, [#allocation6], %s1417_s20, %s1418_s21, %s1419_s22  }
   0xe   :  { %s62_s12 = sshll.u32 %s1424_s11, 4  ;;  %s63_s12 = int_to_ptr.vmem [resolvable:$true] %s62_s12 }
   0xf   :  { %68 = dma.hbm_to_vmem [thread:$0]  %s61_s10, 16384, %s63_s12, [#allocation9], %s1421_s30, %s1421_s30, %s1422_s5  }
  0x10   :  { %1408 = dma.done.wait [#allocation3], 512  }
  0x11   :  { %1409 = vsyncadd [#allocation3], 4294966784 }
  0x12   :  { %1410 = dma.done.wait [#allocation6], 32768  }
  0x13   :  { %1411 = vsyncadd [#allocation6], 4294934528 }
  0x14   :  { %1412 = dma.done.wait [#allocation9], 16384  }
  0x15   :  { %1413 = vsyncadd [#allocation9], 4294950912  ;;  %v159_v0 = vld [vmem:[#allocation5 + $0x1e0] sm:$0xff]  ;;  %v160_v2 = vld [vmem:[#allocation5 + $0x1e8] sm:$0xff]  ;;  %s1425_s2 = smov [#allocation10]   ;;  %s1221_s15 = sshll.u32 %s1761_s4, 4  ;;  %s1222_s15 = int_to_ptr.hbm [resolvable:$true] %s1221_s15 }
  0x16   :  { %v223_v1 = vld [vmem:[#allocation5 + $0x3e0] sm:$0xff]  ;;  %227 = vmatpush.msra.mxu0 %v159_v0  ;;  %v224_v3 = vld [vmem:[#allocation5 + $0x3e8] sm:$0xff]  ;;  %273 = vmatpush.msra.mxu2 %v160_v2  ;;  %v161_v0 = vld [vmem:[#allocation5 + $0x1f0] sm:$0xff]  ;;  %s1219_s3 = sshll.u32 %s1425_s2, 4  ;;  %s1220_s3 = int_to_ptr.vmem [resolvable:$true] %s1219_s3 }
  0x17   :  { %250 = vmatpush.msra.mxu1 %v223_v1  ;;  %v155_v4 = vld [vmem:[#allocation5 + $0x1c0] sm:$0xff]  ;;  %296 = vmatpush.msra.mxu3 %v224_v3  ;;  %v156_v6 = vld [vmem:[#allocation5 + $0x1c8] sm:$0xff]  ;;  %v225_v1 = vld [vmem:[#allocation5 + $0x3f0] sm:$0xff] }
  0x18   :  { %v219_v5 = vld [vmem:[#allocation5 + $0x3c0] sm:$0xff]  ;;  %v220_v7 = vld [vmem:[#allocation5 + $0x3c8] sm:$0xff]  ;;  %228 = vmatpush.msra.mxu0 %v155_v4  ;;  %274 = vmatpush.msra.mxu2 %v156_v6  ;;  %v162_v2 = vld [vmem:[#allocation5 + $0x1f8] sm:$0xff] }
  0x19   :  { %v151_v8 = vld [vmem:[#allocation5 + $0x1a0] sm:$0xff]  ;;  %251 = vmatpush.msra.mxu1 %v219_v5  ;;  %v152_v10 = vld [vmem:[#allocation5 + $0x1a8] sm:$0xff]  ;;  %297 = vmatpush.msra.mxu3 %v220_v7  ;;  %v226_v3 = vld [vmem:[#allocation5 + $0x3f8] sm:$0xff] }
  0x1a   :  { %v215_v9 = vld [vmem:[#allocation5 + $0x3a0] sm:$0xff]  ;;  %v216_v11 = vld [vmem:[#allocation5 + $0x3a8] sm:$0xff]  ;;  %229 = vmatpush.msra.mxu0 %v151_v8  ;;  %275 = vmatpush.msra.mxu2 %v152_v10  ;;  %v157_v4 = vld [vmem:[#allocation5 + $0x1d0] sm:$0xff] }
  0x1b   :  { %v147_v12 = vld [vmem:[#allocation5 + $0x180] sm:$0xff]  ;;  %252 = vmatpush.msra.mxu1 %v215_v9  ;;  %v148_v14 = vld [vmem:[#allocation5 + $0x188] sm:$0xff]  ;;  %298 = vmatpush.msra.mxu3 %v216_v11  ;;  %v221_v5 = vld [vmem:[#allocation5 + $0x3d0] sm:$0xff] }
  0x1c   :  { %v211_v13 = vld [vmem:[#allocation5 + $0x380] sm:$0xff]  ;;  %v212_v15 = vld [vmem:[#allocation5 + $0x388] sm:$0xff]  ;;  %230 = vmatpush.msra.mxu0 %v147_v12  ;;  %276 = vmatpush.msra.mxu2 %v148_v14  ;;  %v158_v6 = vld [vmem:[#allocation5 + $0x1d8] sm:$0xff] }
  0x1d   :  { %v143_v16 = vld [vmem:[#allocation5 + $0x160] sm:$0xff]  ;;  %253 = vmatpush.msra.mxu1 %v211_v13  ;;  %v144_v18 = vld [vmem:[#allocation5 + $0x168] sm:$0xff]  ;;  %299 = vmatpush.msra.mxu3 %v212_v15  ;;  %v222_v7 = vld [vmem:[#allocation5 + $0x3d8] sm:$0xff] }
  0x1e   :  { %v207_v17 = vld [vmem:[#allocation5 + $0x360] sm:$0xff]  ;;  %v208_v19 = vld [vmem:[#allocation5 + $0x368] sm:$0xff]  ;;  %231 = vmatpush.msra.mxu0 %v143_v16  ;;  %277 = vmatpush.msra.mxu2 %v144_v18  ;;  %v153_v10 = vld [vmem:[#allocation5 + $0x1b0] sm:$0xff] }
  0x1f   :  { %v139_v20 = vld [vmem:[#allocation5 + $0x140] sm:$0xff]  ;;  %254 = vmatpush.msra.mxu1 %v207_v17  ;;  %v140_v22 = vld [vmem:[#allocation5 + $0x148] sm:$0xff]  ;;  %300 = vmatpush.msra.mxu3 %v208_v19  ;;  %v217_v11 = vld [vmem:[#allocation5 + $0x3b0] sm:$0xff] }
  0x20   :  { %v203_v21 = vld [vmem:[#allocation5 + $0x340] sm:$0xff]  ;;  %v204_v23 = vld [vmem:[#allocation5 + $0x348] sm:$0xff]  ;;  %232 = vmatpush.msra.mxu0 %v139_v20  ;;  %278 = vmatpush.msra.mxu2 %v140_v22  ;;  %v154_v12 = vld [vmem:[#allocation5 + $0x1b8] sm:$0xff] }
  0x21   :  { %v135_v24 = vld [vmem:[#allocation5 + $0x120] sm:$0xff]  ;;  %255 = vmatpush.msra.mxu1 %v203_v21  ;;  %v136_v26 = vld [vmem:[#allocation5 + $0x128] sm:$0xff]  ;;  %301 = vmatpush.msra.mxu3 %v204_v23  ;;  %v218_v13 = vld [vmem:[#allocation5 + $0x3b8] sm:$0xff] }
  0x22   :  { %v199_v25 = vld [vmem:[#allocation5 + $0x320] sm:$0xff]  ;;  %v200_v27 = vld [vmem:[#allocation5 + $0x328] sm:$0xff]  ;;  %233 = vmatpush.msra.mxu0 %v135_v24  ;;  %279 = vmatpush.msra.mxu2 %v136_v26  ;;  %v149_v14 = vld [vmem:[#allocation5 + $0x190] sm:$0xff] }
  0x23   :  { %v131_v28 = vld [vmem:[#allocation5 + $0x100] sm:$0xff]  ;;  %256 = vmatpush.msra.mxu1 %v199_v25  ;;  %v132_v30 = vld [vmem:[#allocation5 + $0x108] sm:$0xff]  ;;  %302 = vmatpush.msra.mxu3 %v200_v27  ;;  %v213_v15 = vld [vmem:[#allocation5 + $0x390] sm:$0xff] }
  0x24   :  { %v195_v29 = vld [vmem:[#allocation5 + $0x300] sm:$0xff]  ;;  %v196_v31 = vld [vmem:[#allocation5 + $0x308] sm:$0xff]  ;;  %234 = vmatpush.msra.mxu0 %v131_v28  ;;  %280 = vmatpush.msra.mxu2 %v132_v30  ;;  %v150_v16 = vld [vmem:[#allocation5 + $0x198] sm:$0xff] }
  0x25   :  { %v127_v32 = vld [vmem:[#allocation5 + $0xe0] sm:$0xff]  ;;  %257 = vmatpush.msra.mxu1 %v195_v29  ;;  %v128_v34 = vld [vmem:[#allocation5 + $0xe8] sm:$0xff]  ;;  %303 = vmatpush.msra.mxu3 %v196_v31  ;;  %v214_v17 = vld [vmem:[#allocation5 + $0x398] sm:$0xff] }
  0x26   :  { %v191_v33 = vld [vmem:[#allocation5 + $0x2e0] sm:$0xff]  ;;  %v192_v35 = vld [vmem:[#allocation5 + $0x2e8] sm:$0xff]  ;;  %235 = vmatpush.msra.mxu0 %v127_v32  ;;  %281 = vmatpush.msra.mxu2 %v128_v34  ;;  %v145_v18 = vld [vmem:[#allocation5 + $0x170] sm:$0xff] }
  0x27   :  { %v123_v36 = vld [vmem:[#allocation5 + $0xc0] sm:$0xff]  ;;  %258 = vmatpush.msra.mxu1 %v191_v33  ;;  %v124_v38 = vld [vmem:[#allocation5 + $0xc8] sm:$0xff]  ;;  %304 = vmatpush.msra.mxu3 %v192_v35  ;;  %v209_v19 = vld [vmem:[#allocation5 + $0x370] sm:$0xff] }
  0x28   :  { %v187_v37 = vld [vmem:[#allocation5 + $0x2c0] sm:$0xff]  ;;  %v188_v39 = vld [vmem:[#allocation5 + $0x2c8] sm:$0xff]  ;;  %236 = vmatpush.msra.mxu0 %v123_v36  ;;  %282 = vmatpush.msra.mxu2 %v124_v38  ;;  %v146_v20 = vld [vmem:[#allocation5 + $0x178] sm:$0xff] }
  0x29   :  { %v119_v40 = vld [vmem:[#allocation5 + $0xa0] sm:$0xff]  ;;  %259 = vmatpush.msra.mxu1 %v187_v37  ;;  %v120_v42 = vld [vmem:[#allocation5 + $0xa8] sm:$0xff]  ;;  %305 = vmatpush.msra.mxu3 %v188_v39  ;;  %v210_v21 = vld [vmem:[#allocation5 + $0x378] sm:$0xff] }
  0x2a   :  { %v183_v41 = vld [vmem:[#allocation5 + $0x2a0] sm:$0xff]  ;;  %v184_v43 = vld [vmem:[#allocation5 + $0x2a8] sm:$0xff]  ;;  %237 = vmatpush.msra.mxu0 %v119_v40  ;;  %283 = vmatpush.msra.mxu2 %v120_v42  ;;  %v141_v22 = vld [vmem:[#allocation5 + $0x150] sm:$0xff] }
  0x2b   :  { %v115_v44 = vld [vmem:[#allocation5 + $0x80] sm:$0xff]  ;;  %260 = vmatpush.msra.mxu1 %v183_v41  ;;  %v116_v46 = vld [vmem:[#allocation5 + $0x88] sm:$0xff]  ;;  %306 = vmatpush.msra.mxu3 %v184_v43  ;;  %v205_v23 = vld [vmem:[#allocation5 + $0x350] sm:$0xff] }
  0x2c   :  { %v179_v45 = vld [vmem:[#allocation5 + $0x280] sm:$0xff]  ;;  %v180_v47 = vld [vmem:[#allocation5 + $0x288] sm:$0xff]  ;;  %238 = vmatpush.msra.mxu0 %v115_v44  ;;  %284 = vmatpush.msra.mxu2 %v116_v46  ;;  %v142_v24 = vld [vmem:[#allocation5 + $0x158] sm:$0xff] }
  0x2d   :  { %v111_v48 = vld [vmem:[#allocation5 + $0x60] sm:$0xff]  ;;  %261 = vmatpush.msra.mxu1 %v179_v45  ;;  %v112_v50 = vld [vmem:[#allocation5 + $0x68] sm:$0xff]  ;;  %307 = vmatpush.msra.mxu3 %v180_v47  ;;  %v206_v25 = vld [vmem:[#allocation5 + $0x358] sm:$0xff] }
  0x2e   :  { %v175_v49 = vld [vmem:[#allocation5 + $0x260] sm:$0xff]  ;;  %v176_v51 = vld [vmem:[#allocation5 + $0x268] sm:$0xff]  ;;  %239 = vmatpush.msra.mxu0 %v111_v48  ;;  %285 = vmatpush.msra.mxu2 %v112_v50  ;;  %v137_v26 = vld [vmem:[#allocation5 + $0x130] sm:$0xff] }
  0x2f   :  { %v107_v52 = vld [vmem:[#allocation5 + $0x40] sm:$0xff]  ;;  %262 = vmatpush.msra.mxu1 %v175_v49  ;;  %v108_v54 = vld [vmem:[#allocation5 + $0x48] sm:$0xff]  ;;  %308 = vmatpush.msra.mxu3 %v176_v51  ;;  %v201_v27 = vld [vmem:[#allocation5 + $0x330] sm:$0xff] }
  0x30   :  { %v171_v53 = vld [vmem:[#allocation5 + $0x240] sm:$0xff]  ;;  %v172_v55 = vld [vmem:[#allocation5 + $0x248] sm:$0xff]  ;;  %240 = vmatpush.msra.mxu0 %v107_v52  ;;  %286 = vmatpush.msra.mxu2 %v108_v54  ;;  %v138_v28 = vld [vmem:[#allocation5 + $0x138] sm:$0xff] }
  0x31   :  { %v103_v56 = vld [vmem:[#allocation5 + $0x20] sm:$0xff]  ;;  %263 = vmatpush.msra.mxu1 %v171_v53  ;;  %v104_v58 = vld [vmem:[#allocation5 + $0x28] sm:$0xff]  ;;  %309 = vmatpush.msra.mxu3 %v172_v55  ;;  %v202_v29 = vld [vmem:[#allocation5 + $0x338] sm:$0xff] }
  0x32   :  { %v167_v57 = vld [vmem:[#allocation5 + $0x220] sm:$0xff]  ;;  %v168_v59 = vld [vmem:[#allocation5 + $0x228] sm:$0xff]  ;;  %241 = vmatpush.msra.mxu0 %v103_v56  ;;  %287 = vmatpush.msra.mxu2 %v104_v58  ;;  %v133_v30 = vld [vmem:[#allocation5 + $0x110] sm:$0xff] }
  0x33   :  { %v99_v60 = vld [vmem:[#allocation5] sm:$0xff]  ;;  %264 = vmatpush.msra.mxu1 %v167_v57  ;;  %v100_v62 = vld [vmem:[#allocation5 + $0x8] sm:$0xff]  ;;  %310 = vmatpush.msra.mxu3 %v168_v59  ;;  %v197_v31 = vld [vmem:[#allocation5 + $0x310] sm:$0xff] }
  0x34   :  { %v163_v61 = vld [vmem:[#allocation5 + $0x200] sm:$0xff]  ;;  %v164_v63 = vld [vmem:[#allocation5 + $0x208] sm:$0xff]  ;;  %242 = vmatpush.msra.mxu0 %v99_v60  ;;  %288 = vmatpush.msra.mxu2 %v100_v62  ;;  %v134_v32 = vld [vmem:[#allocation5 + $0x118] sm:$0xff] }
  0x35   :  { %265 = vmatpush.msra.mxu1 %v163_v61  ;;  %311 = vmatpush.msra.mxu3 %v164_v63  ;;  %v1469_v8 = vld [vmem:[#allocation2] sm:$0xff]  ;;  %v1471_v9 = vld [vmem:[#allocation2 + $0x8] sm:$0xff]  ;;  %v198_v33 = vld [vmem:[#allocation5 + $0x318] sm:$0xff] }
  0x36   :  { %319 = vmatpush.msrb.mxu0 %v161_v0  ;;  %365 = vmatpush.msrb.mxu2 %v162_v2  ;;  %v129_v34 = vld [vmem:[#allocation5 + $0xf0] sm:$0xff]  ;;  %v130_v36 = vld [vmem:[#allocation5 + $0xf8] sm:$0xff] }
  0x37   :  { %342 = vmatpush.msrb.mxu1 %v225_v1  ;;  %388 = vmatpush.msrb.mxu3 %v226_v3  ;;  %v193_v35 = vld [vmem:[#allocation5 + $0x2f0] sm:$0xff]  ;;  %v194_v37 = vld [vmem:[#allocation5 + $0x2f8] sm:$0xff] }
  0x38   :  { %320 = vmatpush.msrb.mxu0 %v157_v4  ;;  %366 = vmatpush.msrb.mxu2 %v158_v6  ;;  %v125_v38 = vld [vmem:[#allocation5 + $0xd0] sm:$0xff]  ;;  %v126_v40 = vld [vmem:[#allocation5 + $0xd8] sm:$0xff]  ;;  %v471_v4 = vld [vmem:[#allocation7 + $0x1e0] sm:$0xff] }
  0x39   :  { %343 = vmatpush.msrb.mxu1 %v221_v5  ;;  %389 = vmatpush.msrb.mxu3 %v222_v7  ;;  %v189_v39 = vld [vmem:[#allocation5 + $0x2d0] sm:$0xff]  ;;  %v190_v41 = vld [vmem:[#allocation5 + $0x2d8] sm:$0xff]  ;;  %v535_v5 = vld [vmem:[#allocation7 + $0x3e0] sm:$0xff] }
  0x3a   :  { %289 = vmatmul.f32.vlgmr.msra.gmra.mxu2 %v1469_v8  ;;  %312 = vmatmul.f32.vlgmr.msra.gmra.mxu3 %v1471_v9  ;;  %v121_v42 = vld [vmem:[#allocation5 + $0xb0] sm:$0xff]  ;;  %v122_v44 = vld [vmem:[#allocation5 + $0xb8] sm:$0xff]  ;;  %v472_v6 = vld [vmem:[#allocation7 + $0x1e8] sm:$0xff] }
  0x3b   :  { %321 = vmatpush.msrb.mxu0 %v153_v10  ;;  %344 = vmatpush.msrb.mxu1 %v217_v11  ;;  %v185_v43 = vld [vmem:[#allocation5 + $0x2b0] sm:$0xff]  ;;  %v186_v45 = vld [vmem:[#allocation5 + $0x2b8] sm:$0xff]  ;;  %v536_v7 = vld [vmem:[#allocation7 + $0x3e8] sm:$0xff] }
  0x3c   :  { %367 = vmatpush.msrb.mxu2 %v154_v12  ;;  %390 = vmatpush.msrb.mxu3 %v218_v13  ;;  %v117_v46 = vld [vmem:[#allocation5 + $0x90] sm:$0xff]  ;;  %v118_v48 = vld [vmem:[#allocation5 + $0x98] sm:$0xff]  ;;  %v467_v10 = vld [vmem:[#allocation7 + $0x1c0] sm:$0xff] }
  0x3d   :  { %322 = vmatpush.msrb.mxu0 %v149_v14  ;;  %345 = vmatpush.msrb.mxu1 %v213_v15  ;;  %v181_v47 = vld [vmem:[#allocation5 + $0x290] sm:$0xff]  ;;  %v182_v49 = vld [vmem:[#allocation5 + $0x298] sm:$0xff]  ;;  %v531_v11 = vld [vmem:[#allocation7 + $0x3c0] sm:$0xff] }
  0x3e   :  { %368 = vmatpush.msrb.mxu2 %v150_v16  ;;  %391 = vmatpush.msrb.mxu3 %v214_v17  ;;  %v113_v50 = vld [vmem:[#allocation5 + $0x70] sm:$0xff]  ;;  %v114_v52 = vld [vmem:[#allocation5 + $0x78] sm:$0xff]  ;;  %v468_v12 = vld [vmem:[#allocation7 + $0x1c8] sm:$0xff] }
  0x3f   :  { %243 = vmatmul.f32.vlgmr.msra.gmra.mxu0 %v1469_v8  ;;  %266 = vmatmul.f32.vlgmr.msra.gmra.mxu1 %v1471_v9  ;;  %v177_v51 = vld [vmem:[#allocation5 + $0x270] sm:$0xff]  ;;  %v178_v53 = vld [vmem:[#allocation5 + $0x278] sm:$0xff]  ;;  %v532_v13 = vld [vmem:[#allocation7 + $0x3c8] sm:$0xff] }
  0x40   :  { %323 = vmatpush.msrb.mxu0 %v145_v18  ;;  %346 = vmatpush.msrb.mxu1 %v209_v19  ;;  %v1477_v54 = vld [vmem:[#allocation2 + $0x10] sm:$0xff]  ;;  %v1479_v55 = vld [vmem:[#allocation2 + $0x18] sm:$0xff]  ;;  %v463_v14 = vld [vmem:[#allocation7 + $0x1a0] sm:$0xff] }
  0x41   :  { %369 = vmatpush.msrb.mxu2 %v146_v20  ;;  %392 = vmatpush.msrb.mxu3 %v210_v21  ;;  %v109_v56 = vld [vmem:[#allocation5 + $0x50] sm:$0xff]  ;;  %v110_v58 = vld [vmem:[#allocation5 + $0x58] sm:$0xff]  ;;  %v527_v15 = vld [vmem:[#allocation7 + $0x3a0] sm:$0xff] }
  0x42   :  { %324 = vmatpush.msrb.mxu0 %v141_v22  ;;  %347 = vmatpush.msrb.mxu1 %v205_v23  ;;  %v173_v57 = vld [vmem:[#allocation5 + $0x250] sm:$0xff]  ;;  %v174_v59 = vld [vmem:[#allocation5 + $0x258] sm:$0xff]  ;;  %v464_v16 = vld [vmem:[#allocation7 + $0x1a8] sm:$0xff] }
  0x43   :  { %370 = vmatpush.msrb.mxu2 %v142_v24  ;;  %393 = vmatpush.msrb.mxu3 %v206_v25  ;;  %v105_v60 = vld [vmem:[#allocation5 + $0x30] sm:$0xff]  ;;  %v106_v62 = vld [vmem:[#allocation5 + $0x38] sm:$0xff]  ;;  %v528_v17 = vld [vmem:[#allocation7 + $0x3a8] sm:$0xff] }
  0x44   :  { %325 = vmatpush.msrb.mxu0 %v137_v26  ;;  %348 = vmatpush.msrb.mxu1 %v201_v27  ;;  %v169_v61 = vld [vmem:[#allocation5 + $0x230] sm:$0xff]  ;;  %v170_v63 = vld [vmem:[#allocation5 + $0x238] sm:$0xff]  ;;  %v459_v18 = vld [vmem:[#allocation7 + $0x180] sm:$0xff] }
  0x45   :  { %371 = vmatpush.msrb.mxu2 %v138_v28  ;;  %394 = vmatpush.msrb.mxu3 %v202_v29  ;;  %v101_v0 = vld [vmem:[#allocation5 + $0x10] sm:$0xff]  ;;  %v102_v2 = vld [vmem:[#allocation5 + $0x18] sm:$0xff]  ;;  %v523_v19 = vld [vmem:[#allocation7 + $0x380] sm:$0xff] }
  0x46   :  { %326 = vmatpush.msrb.mxu0 %v133_v30  ;;  %349 = vmatpush.msrb.mxu1 %v197_v31  ;;  %v165_v1 = vld [vmem:[#allocation5 + $0x210] sm:$0xff]  ;;  %v166_v3 = vld [vmem:[#allocation5 + $0x218] sm:$0xff]  ;;  %v460_v20 = vld [vmem:[#allocation7 + $0x188] sm:$0xff] }
  0x47   :  { %372 = vmatpush.msrb.mxu2 %v134_v32  ;;  %395 = vmatpush.msrb.mxu3 %v198_v33  ;;  %v524_v21 = vld [vmem:[#allocation7 + $0x388] sm:$0xff]  ;;  %v455_v22 = vld [vmem:[#allocation7 + $0x160] sm:$0xff] }
  0x48   :  { %327 = vmatpush.msrb.mxu0 %v129_v34  ;;  %350 = vmatpush.msrb.mxu1 %v193_v35  ;;  %v519_v23 = vld [vmem:[#allocation7 + $0x360] sm:$0xff]  ;;  %v456_v24 = vld [vmem:[#allocation7 + $0x168] sm:$0xff] }
  0x49   :  { %373 = vmatpush.msrb.mxu2 %v130_v36  ;;  %396 = vmatpush.msrb.mxu3 %v194_v37  ;;  %v520_v25 = vld [vmem:[#allocation7 + $0x368] sm:$0xff]  ;;  %v451_v26 = vld [vmem:[#allocation7 + $0x140] sm:$0xff] }
  0x4a   :  { %328 = vmatpush.msrb.mxu0 %v125_v38  ;;  %351 = vmatpush.msrb.mxu1 %v189_v39  ;;  %v515_v27 = vld [vmem:[#allocation7 + $0x340] sm:$0xff]  ;;  %v452_v28 = vld [vmem:[#allocation7 + $0x148] sm:$0xff] }
  0x4b   :  { %374 = vmatpush.msrb.mxu2 %v126_v40  ;;  %397 = vmatpush.msrb.mxu3 %v190_v41  ;;  %v516_v29 = vld [vmem:[#allocation7 + $0x348] sm:$0xff]  ;;  %v447_v30 = vld [vmem:[#allocation7 + $0x120] sm:$0xff] }
  0x4c   :  { %329 = vmatpush.msrb.mxu0 %v121_v42  ;;  %352 = vmatpush.msrb.mxu1 %v185_v43  ;;  %v511_v31 = vld [vmem:[#allocation7 + $0x320] sm:$0xff]  ;;  %v448_v32 = vld [vmem:[#allocation7 + $0x128] sm:$0xff] }
  0x4d   :  { %375 = vmatpush.msrb.mxu2 %v122_v44  ;;  %398 = vmatpush.msrb.mxu3 %v186_v45  ;;  %v512_v33 = vld [vmem:[#allocation7 + $0x328] sm:$0xff]  ;;  %v443_v34 = vld [vmem:[#allocation7 + $0x100] sm:$0xff] }
  0x4e   :  { %330 = vmatpush.msrb.mxu0 %v117_v46  ;;  %353 = vmatpush.msrb.mxu1 %v181_v47  ;;  %v507_v35 = vld [vmem:[#allocation7 + $0x300] sm:$0xff]  ;;  %v444_v36 = vld [vmem:[#allocation7 + $0x108] sm:$0xff] }
  0x4f   :  { %376 = vmatpush.msrb.mxu2 %v118_v48  ;;  %399 = vmatpush.msrb.mxu3 %v182_v49  ;;  %v508_v37 = vld [vmem:[#allocation7 + $0x308] sm:$0xff]  ;;  %v439_v38 = vld [vmem:[#allocation7 + $0xe0] sm:$0xff] }
  0x50   :  { %331 = vmatpush.msrb.mxu0 %v113_v50  ;;  %354 = vmatpush.msrb.mxu1 %v177_v51  ;;  %v503_v39 = vld [vmem:[#allocation7 + $0x2e0] sm:$0xff]  ;;  %v440_v40 = vld [vmem:[#allocation7 + $0xe8] sm:$0xff] }
  0x51   :  { %377 = vmatpush.msrb.mxu2 %v114_v52  ;;  %400 = vmatpush.msrb.mxu3 %v178_v53  ;;  %v504_v41 = vld [vmem:[#allocation7 + $0x2e8] sm:$0xff]  ;;  %v435_v42 = vld [vmem:[#allocation7 + $0xc0] sm:$0xff] }
  0x52   :  { %292 = vmatmul.f32.gmra.mxu2 %v1477_v54  ;;  %315 = vmatmul.f32.gmra.mxu3 %v1479_v55  ;;  %v499_v43 = vld [vmem:[#allocation7 + $0x2c0] sm:$0xff]  ;;  %v436_v44 = vld [vmem:[#allocation7 + $0xc8] sm:$0xff] }
  0x53   :  { %332 = vmatpush.msrb.mxu0 %v109_v56  ;;  %355 = vmatpush.msrb.mxu1 %v173_v57  ;;  %v500_v45 = vld [vmem:[#allocation7 + $0x2c8] sm:$0xff]  ;;  %v431_v46 = vld [vmem:[#allocation7 + $0xa0] sm:$0xff] }
  0x54   :  { %378 = vmatpush.msrb.mxu2 %v110_v58  ;;  %401 = vmatpush.msrb.mxu3 %v174_v59  ;;  %v495_v47 = vld [vmem:[#allocation7 + $0x2a0] sm:$0xff]  ;;  %v432_v48 = vld [vmem:[#allocation7 + $0xa8] sm:$0xff] }
  0x55   :  { %333 = vmatpush.msrb.mxu0 %v105_v60  ;;  %356 = vmatpush.msrb.mxu1 %v169_v61  ;;  %v496_v49 = vld [vmem:[#allocation7 + $0x2a8] sm:$0xff]  ;;  %v427_v50 = vld [vmem:[#allocation7 + $0x80] sm:$0xff] }
  0x56   :  { %379 = vmatpush.msrb.mxu2 %v106_v62  ;;  %402 = vmatpush.msrb.mxu3 %v170_v63  ;;  %v491_v51 = vld [vmem:[#allocation7 + $0x280] sm:$0xff]  ;;  %v428_v52 = vld [vmem:[#allocation7 + $0x88] sm:$0xff] }
  0x57   :  { %246 = vmatmul.f32.gmra.mxu0 %v1477_v54  ;;  %269 = vmatmul.f32.gmra.mxu1 %v1479_v55  ;;  %v492_v53 = vld [vmem:[#allocation7 + $0x288] sm:$0xff]  ;;  %v423_v56 = vld [vmem:[#allocation7 + $0x60] sm:$0xff] }
  0x58   :  { %334 = vmatpush.msrb.mxu0 %v101_v0  ;;  %357 = vmatpush.msrb.mxu1 %v165_v1  ;;  %v487_v57 = vld [vmem:[#allocation7 + $0x260] sm:$0xff]  ;;  %v424_v58 = vld [vmem:[#allocation7 + $0x68] sm:$0xff] }
  0x59   :  { %380 = vmatpush.msrb.mxu2 %v102_v2  ;;  %403 = vmatpush.msrb.mxu3 %v166_v3  ;;  %v488_v59 = vld [vmem:[#allocation7 + $0x268] sm:$0xff]  ;;  %v419_v60 = vld [vmem:[#allocation7 + $0x40] sm:$0xff] }
  0x5a   :  { %539 = vmatpush.msra.mxu0 %v471_v4  ;;  %562 = vmatpush.msra.mxu1 %v535_v5  ;;  %v483_v61 = vld [vmem:[#allocation7 + $0x240] sm:$0xff]  ;;  %v420_v62 = vld [vmem:[#allocation7 + $0x48] sm:$0xff] }
  0x5b   :  { %585 = vmatpush.msra.mxu2 %v472_v6  ;;  %608 = vmatpush.msra.mxu3 %v536_v7  ;;  %v484_v63 = vld [vmem:[#allocation7 + $0x248] sm:$0xff]  ;;  %v415_v0 = vld [vmem:[#allocation7 + $0x20] sm:$0xff] }
  0x5c   :  { %381 = vmatmul.f32.vlgmr.msrb.gmra.mxu2 %v1469_v8  ;;  %404 = vmatmul.f32.vlgmr.msrb.gmra.mxu3 %v1471_v9  ;;  %v479_v1 = vld [vmem:[#allocation7 + $0x220] sm:$0xff]  ;;  %v416_v2 = vld [vmem:[#allocation7 + $0x28] sm:$0xff] }
  0x5d   :  { %540 = vmatpush.msra.mxu0 %v467_v10  ;;  %563 = vmatpush.msra.mxu1 %v531_v11  ;;  %v480_v3 = vld [vmem:[#allocation7 + $0x228] sm:$0xff]  ;;  %v411_v4 = vld [vmem:[#allocation7] sm:$0xff]  ;;  %v473_v10 = vld [vmem:[#allocation7 + $0x1f0] sm:$0xff] }
  0x5e   :  { %586 = vmatpush.msra.mxu2 %v468_v12  ;;  %609 = vmatpush.msra.mxu3 %v532_v13  ;;  %v475_v5 = vld [vmem:[#allocation7 + $0x200] sm:$0xff]  ;;  %v412_v6 = vld [vmem:[#allocation7 + $0x8] sm:$0xff]  ;;  %v537_v11 = vld [vmem:[#allocation7 + $0x3f0] sm:$0xff] }
  0x5f   :  { %541 = vmatpush.msra.mxu0 %v463_v14  ;;  %564 = vmatpush.msra.mxu1 %v527_v15  ;;  %v476_v7 = vld [vmem:[#allocation7 + $0x208] sm:$0xff]  ;;  %v474_v12 = vld [vmem:[#allocation7 + $0x1f8] sm:$0xff]  ;;  %v469_v14 = vld [vmem:[#allocation7 + $0x1d0] sm:$0xff] }
  0x60   :  { %587 = vmatpush.msra.mxu2 %v464_v16  ;;  %610 = vmatpush.msra.mxu3 %v528_v17  ;;  %v538_v13 = vld [vmem:[#allocation7 + $0x3f8] sm:$0xff]  ;;  %v533_v15 = vld [vmem:[#allocation7 + $0x3d0] sm:$0xff] }
  0x61   :  { %335 = vmatmul.f32.vlgmr.msrb.gmra.mxu0 %v1469_v8  ;;  %358 = vmatmul.f32.vlgmr.msrb.gmra.mxu1 %v1471_v9  ;;  %v470_v16 = vld [vmem:[#allocation7 + $0x1d8] sm:$0xff] }
  0x62   :  { %542 = vmatpush.msra.mxu0 %v459_v18  ;;  %565 = vmatpush.msra.mxu1 %v523_v19  ;;  %v534_v17 = vld [vmem:[#allocation7 + $0x3d8] sm:$0xff]  ;;  %v465_v18 = vld [vmem:[#allocation7 + $0x1b0] sm:$0xff] }
  0x63   :  { %588 = vmatpush.msra.mxu2 %v460_v20  ;;  %611 = vmatpush.msra.mxu3 %v524_v21  ;;  %v529_v19 = vld [vmem:[#allocation7 + $0x3b0] sm:$0xff]  ;;  %v466_v20 = vld [vmem:[#allocation7 + $0x1b8] sm:$0xff] }
  0x64   :  { %543 = vmatpush.msra.mxu0 %v455_v22  ;;  %566 = vmatpush.msra.mxu1 %v519_v23  ;;  %v530_v21 = vld [vmem:[#allocation7 + $0x3b8] sm:$0xff]  ;;  %v461_v22 = vld [vmem:[#allocation7 + $0x190] sm:$0xff] }
  0x65   :  { %589 = vmatpush.msra.mxu2 %v456_v24  ;;  %612 = vmatpush.msra.mxu3 %v520_v25  ;;  %v525_v23 = vld [vmem:[#allocation7 + $0x390] sm:$0xff]  ;;  %v462_v24 = vld [vmem:[#allocation7 + $0x198] sm:$0xff] }
  0x66   :  { %384 = vmatmul.f32.gmra.mxu2 %v1477_v54  ;;  %407 = vmatmul.f32.gmra.mxu3 %v1479_v55  ;;  %v526_v25 = vld [vmem:[#allocation7 + $0x398] sm:$0xff] }
  0x67   :  { %544 = vmatpush.msra.mxu0 %v451_v26  ;;  %567 = vmatpush.msra.mxu1 %v515_v27  ;;  %v457_v26 = vld [vmem:[#allocation7 + $0x170] sm:$0xff] }
  0x68   :  { %590 = vmatpush.msra.mxu2 %v452_v28  ;;  %613 = vmatpush.msra.mxu3 %v516_v29  ;;  %v521_v27 = vld [vmem:[#allocation7 + $0x370] sm:$0xff]  ;;  %v458_v28 = vld [vmem:[#allocation7 + $0x178] sm:$0xff] }
  0x69   :  { %545 = vmatpush.msra.mxu0 %v447_v30  ;;  %568 = vmatpush.msra.mxu1 %v511_v31  ;;  %v522_v29 = vld [vmem:[#allocation7 + $0x378] sm:$0xff]  ;;  %v453_v30 = vld [vmem:[#allocation7 + $0x150] sm:$0xff] }
  0x6a   :  { %591 = vmatpush.msra.mxu2 %v448_v32  ;;  %614 = vmatpush.msra.mxu3 %v512_v33  ;;  %v517_v31 = vld [vmem:[#allocation7 + $0x350] sm:$0xff]  ;;  %v454_v32 = vld [vmem:[#allocation7 + $0x158] sm:$0xff] }
  0x6b   :  { %338 = vmatmul.f32.gmra.mxu0 %v1477_v54  ;;  %361 = vmatmul.f32.gmra.mxu1 %v1479_v55  ;;  %v518_v33 = vld [vmem:[#allocation7 + $0x358] sm:$0xff] }
  0x6c   :  { %546 = vmatpush.msra.mxu0 %v443_v34  ;;  %569 = vmatpush.msra.mxu1 %v507_v35  ;;  %v449_v34 = vld [vmem:[#allocation7 + $0x130] sm:$0xff] }
  0x6d   :  { %592 = vmatpush.msra.mxu2 %v444_v36  ;;  %615 = vmatpush.msra.mxu3 %v508_v37  ;;  %v513_v35 = vld [vmem:[#allocation7 + $0x330] sm:$0xff]  ;;  %v450_v36 = vld [vmem:[#allocation7 + $0x138] sm:$0xff] }
  0x6e   :  { %547 = vmatpush.msra.mxu0 %v439_v38  ;;  %570 = vmatpush.msra.mxu1 %v503_v39  ;;  %v514_v37 = vld [vmem:[#allocation7 + $0x338] sm:$0xff]  ;;  %v445_v38 = vld [vmem:[#allocation7 + $0x110] sm:$0xff] }
  0x6f   :  { %593 = vmatpush.msra.mxu2 %v440_v40  ;;  %616 = vmatpush.msra.mxu3 %v504_v41  ;;  %v509_v39 = vld [vmem:[#allocation7 + $0x310] sm:$0xff]  ;;  %v446_v40 = vld [vmem:[#allocation7 + $0x118] sm:$0xff] }
  0x70   :  { %548 = vmatpush.msra.mxu0 %v435_v42  ;;  %571 = vmatpush.msra.mxu1 %v499_v43  ;;  %v510_v41 = vld [vmem:[#allocation7 + $0x318] sm:$0xff]  ;;  %v441_v42 = vld [vmem:[#allocation7 + $0xf0] sm:$0xff] }
  0x71   :  { %594 = vmatpush.msra.mxu2 %v436_v44  ;;  %617 = vmatpush.msra.mxu3 %v500_v45  ;;  %v505_v43 = vld [vmem:[#allocation7 + $0x2f0] sm:$0xff]  ;;  %v442_v44 = vld [vmem:[#allocation7 + $0xf8] sm:$0xff] }
  0x72   :  { %549 = vmatpush.msra.mxu0 %v431_v46  ;;  %572 = vmatpush.msra.mxu1 %v495_v47  ;;  %v506_v45 = vld [vmem:[#allocation7 + $0x2f8] sm:$0xff]  ;;  %v437_v46 = vld [vmem:[#allocation7 + $0xd0] sm:$0xff] }
  0x73   :  { %595 = vmatpush.msra.mxu2 %v432_v48  ;;  %618 = vmatpush.msra.mxu3 %v496_v49  ;;  %v501_v47 = vld [vmem:[#allocation7 + $0x2d0] sm:$0xff]  ;;  %v438_v48 = vld [vmem:[#allocation7 + $0xd8] sm:$0xff] }
  0x74   :  { %550 = vmatpush.msra.mxu0 %v427_v50  ;;  %573 = vmatpush.msra.mxu1 %v491_v51  ;;  %v502_v49 = vld [vmem:[#allocation7 + $0x2d8] sm:$0xff]  ;;  %v433_v50 = vld [vmem:[#allocation7 + $0xb0] sm:$0xff] }
  0x75   :  { %596 = vmatpush.msra.mxu2 %v428_v52  ;;  %619 = vmatpush.msra.mxu3 %v492_v53  ;;  %v497_v51 = vld [vmem:[#allocation7 + $0x2b0] sm:$0xff]  ;;  %v434_v52 = vld [vmem:[#allocation7 + $0xb8] sm:$0xff] }
  0x76   :  { %551 = vmatpush.msra.mxu0 %v423_v56  ;;  %574 = vmatpush.msra.mxu1 %v487_v57  ;;  %v498_v53 = vld [vmem:[#allocation7 + $0x2b8] sm:$0xff]  ;;  %v429_v56 = vld [vmem:[#allocation7 + $0x90] sm:$0xff] }
  0x77   :  { %597 = vmatpush.msra.mxu2 %v424_v58  ;;  %620 = vmatpush.msra.mxu3 %v488_v59  ;;  %v493_v57 = vld [vmem:[#allocation7 + $0x290] sm:$0xff]  ;;  %v430_v58 = vld [vmem:[#allocation7 + $0x98] sm:$0xff] }
  0x78   :  { %552 = vmatpush.msra.mxu0 %v419_v60  ;;  %575 = vmatpush.msra.mxu1 %v483_v61  ;;  %v494_v59 = vld [vmem:[#allocation7 + $0x298] sm:$0xff]  ;;  %v425_v60 = vld [vmem:[#allocation7 + $0x70] sm:$0xff] }
  0x79   :  { %598 = vmatpush.msra.mxu2 %v420_v62  ;;  %621 = vmatpush.msra.mxu3 %v484_v63  ;;  %v489_v61 = vld [vmem:[#allocation7 + $0x270] sm:$0xff]  ;;  %v426_v62 = vld [vmem:[#allocation7 + $0x78] sm:$0xff] }
  0x7a   :  { %553 = vmatpush.msra.mxu0 %v415_v0  ;;  %576 = vmatpush.msra.mxu1 %v479_v1  ;;  %v490_v63 = vld [vmem:[#allocation7 + $0x278] sm:$0xff]  ;;  %v421_v0 = vld [vmem:[#allocation7 + $0x50] sm:$0xff] }
  0x7b   :  { %599 = vmatpush.msra.mxu2 %v416_v2  ;;  %622 = vmatpush.msra.mxu3 %v480_v3  ;;  %v485_v1 = vld [vmem:[#allocation7 + $0x250] sm:$0xff]  ;;  %v422_v2 = vld [vmem:[#allocation7 + $0x58] sm:$0xff] }
  0x7c   :  { %554 = vmatpush.msra.mxu0 %v411_v4  ;;  %577 = vmatpush.msra.mxu1 %v475_v5  ;;  %v486_v3 = vld [vmem:[#allocation7 + $0x258] sm:$0xff]  ;;  %v417_v4 = vld [vmem:[#allocation7 + $0x30] sm:$0xff] }
  0x7d   :  { %600 = vmatpush.msra.mxu2 %v412_v6  ;;  %623 = vmatpush.msra.mxu3 %v476_v7  ;;  %v481_v5 = vld [vmem:[#allocation7 + $0x230] sm:$0xff]  ;;  %v418_v6 = vld [vmem:[#allocation7 + $0x38] sm:$0xff] }
  0x7e   :  { %555 = vmatmul.f32.vlgmr.msra.gmra.mxu0 %v1469_v8  ;;  %578 = vmatmul.f32.vlgmr.msra.gmra.mxu1 %v1471_v9  ;;  %v482_v7 = vld [vmem:[#allocation7 + $0x238] sm:$0xff] }
  0x7f   :  { %601 = vmatmul.f32.vlgmr.msra.gmra.mxu2 %v1469_v8  ;;  %624 = vmatmul.f32.vlgmr.msra.gmra.mxu3 %v1471_v9 }
  0x80   :  { %631 = vmatpush.msrb.mxu0 %v473_v10  ;;  %654 = vmatpush.msrb.mxu1 %v537_v11  ;;  %v413_v10 = vld [vmem:[#allocation7 + $0x10] sm:$0xff] }
  0x81   :  { %677 = vmatpush.msrb.mxu2 %v474_v12  ;;  %700 = vmatpush.msrb.mxu3 %v538_v13  ;;  %v477_v11 = vld [vmem:[#allocation7 + $0x210] sm:$0xff]  ;;  %v414_v12 = vld [vmem:[#allocation7 + $0x18] sm:$0xff] }
  0x82   :  { %632 = vmatpush.msrb.mxu0 %v469_v14  ;;  %655 = vmatpush.msrb.mxu1 %v533_v15  ;;  %v478_v13 = vld [vmem:[#allocation7 + $0x218] sm:$0xff]  ;;  %v925_v14 = vld [vmem:[#allocation8 + $0xf0] sm:$0xff]  ;;  %v923_v15 = vld [vmem:[#allocation8 + $0xe0] sm:$0xff] }
  0x83   :  { %678 = vmatpush.msrb.mxu2 %v470_v16  ;;  %701 = vmatpush.msrb.mxu3 %v534_v17  ;;  %v921_v16 = vld [vmem:[#allocation8 + $0xd0] sm:$0xff]  ;;  %v919_v17 = vld [vmem:[#allocation8 + $0xc0] sm:$0xff] }
  0x84   :  { %633 = vmatpush.msrb.mxu0 %v465_v18  ;;  %656 = vmatpush.msrb.mxu1 %v529_v19  ;;  %v957_v18 = vld [vmem:[#allocation8 + $0x1f0] sm:$0xff]  ;;  %v915_v19 = vld [vmem:[#allocation8 + $0xa0] sm:$0xff] }
  0x85   :  { %679 = vmatpush.msrb.mxu2 %v466_v20  ;;  %702 = vmatpush.msrb.mxu3 %v530_v21  ;;  %v953_v20 = vld [vmem:[#allocation8 + $0x1d0] sm:$0xff] }
  0x86   :  { %634 = vmatpush.msrb.mxu0 %v461_v22  ;;  %657 = vmatpush.msrb.mxu1 %v525_v23  ;;  %v913_v21 = vld [vmem:[#allocation8 + $0x90] sm:$0xff]  ;;  %v951_v22 = vld [vmem:[#allocation8 + $0x1c0] sm:$0xff] }
  0x87   :  { %680 = vmatpush.msrb.mxu2 %v462_v24  ;;  %703 = vmatpush.msrb.mxu3 %v526_v25  ;;  %v911_v23 = vld [vmem:[#allocation8 + $0x80] sm:$0xff]  ;;  %v949_v24 = vld [vmem:[#allocation8 + $0x1b0] sm:$0xff] }
  0x88   :  { %558 = vmatmul.f32.gmra.mxu0 %v1477_v54  ;;  %581 = vmatmul.f32.gmra.mxu1 %v1479_v55 }
  0x89   :  { %604 = vmatmul.f32.gmra.mxu2 %v1477_v54  ;;  %627 = vmatmul.f32.gmra.mxu3 %v1479_v55 }
  0x8a   :  { %635 = vmatpush.msrb.mxu0 %v457_v26  ;;  %658 = vmatpush.msrb.mxu1 %v521_v27  ;;  %v909_v26 = vld [vmem:[#allocation8 + $0x70] sm:$0xff]  ;;  %v947_v27 = vld [vmem:[#allocation8 + $0x1a0] sm:$0xff] }
  0x8b   :  { %681 = vmatpush.msrb.mxu2 %v458_v28  ;;  %704 = vmatpush.msrb.mxu3 %v522_v29 }
  0x8c   :  { %636 = vmatpush.msrb.mxu0 %v453_v30  ;;  %659 = vmatpush.msrb.mxu1 %v517_v31  ;;  %v907_v30 = vld [vmem:[#allocation8 + $0x60] sm:$0xff]  ;;  %v945_v31 = vld [vmem:[#allocation8 + $0x190] sm:$0xff] }
  0x8d   :  { %682 = vmatpush.msrb.mxu2 %v454_v32  ;;  %705 = vmatpush.msrb.mxu3 %v518_v33 }
  0x8e   :  { %637 = vmatpush.msrb.mxu0 %v449_v34  ;;  %660 = vmatpush.msrb.mxu1 %v513_v35  ;;  %v905_v34 = vld [vmem:[#allocation8 + $0x50] sm:$0xff]  ;;  %v943_v35 = vld [vmem:[#allocation8 + $0x180] sm:$0xff] }
  0x8f   :  { %683 = vmatpush.msrb.mxu2 %v450_v36  ;;  %706 = vmatpush.msrb.mxu3 %v514_v37  ;;  %v903_v36 = vld [vmem:[#allocation8 + $0x40] sm:$0xff]  ;;  %v941_v37 = vld [vmem:[#allocation8 + $0x170] sm:$0xff] }
  0x90   :  { %638 = vmatpush.msrb.mxu0 %v445_v38  ;;  %661 = vmatpush.msrb.mxu1 %v509_v39  ;;  %v901_v39 = vld [vmem:[#allocation8 + $0x30] sm:$0xff] }
  0x91   :  { %684 = vmatpush.msrb.mxu2 %v446_v40  ;;  %707 = vmatpush.msrb.mxu3 %v510_v41  ;;  %v939_v40 = vld [vmem:[#allocation8 + $0x160] sm:$0xff] }
  0x92   :  { %639 = vmatpush.msrb.mxu0 %v441_v42  ;;  %662 = vmatpush.msrb.mxu1 %v505_v43  ;;  %v899_v41 = vld [vmem:[#allocation8 + $0x20] sm:$0xff]  ;;  %v937_v42 = vld [vmem:[#allocation8 + $0x150] sm:$0xff] }
  0x93   :  { %685 = vmatpush.msrb.mxu2 %v442_v44  ;;  %708 = vmatpush.msrb.mxu3 %v506_v45  ;;  %v897_v43 = vld [vmem:[#allocation8 + $0x10] sm:$0xff]  ;;  %v935_v44 = vld [vmem:[#allocation8 + $0x140] sm:$0xff] }
  0x94   :  { %640 = vmatpush.msrb.mxu0 %v437_v46  ;;  %663 = vmatpush.msrb.mxu1 %v501_v47 }
  0x95   :  { %686 = vmatpush.msrb.mxu2 %v438_v48  ;;  %709 = vmatpush.msrb.mxu3 %v502_v49  ;;  %v895_v49 = vld [vmem:[#allocation8] sm:$0xff] }
  0x96   :  { %641 = vmatpush.msrb.mxu0 %v433_v50  ;;  %664 = vmatpush.msrb.mxu1 %v497_v51  ;;  %v933_v50 = vld [vmem:[#allocation8 + $0x130] sm:$0xff] }
  0x97   :  { %687 = vmatpush.msrb.mxu2 %v434_v52  ;;  %710 = vmatpush.msrb.mxu3 %v498_v53  ;;  %v989_v53 = vld [vmem:[#allocation8 + $0x2f0] sm:$0xff] }
  0x98   :  { %642 = vmatpush.msrb.mxu0 %v429_v56  ;;  %665 = vmatpush.msrb.mxu1 %v493_v57  ;;  %v926_v56 = vld [vmem:[#allocation8 + $0xf8] sm:$0xff] }
  0x99   :  { %688 = vmatpush.msrb.mxu2 %v430_v58  ;;  %711 = vmatpush.msrb.mxu3 %v494_v59  ;;  %v931_v59 = vld [vmem:[#allocation8 + $0x120] sm:$0xff] }
  0x9a   :  { %643 = vmatpush.msrb.mxu0 %v425_v60  ;;  %666 = vmatpush.msrb.mxu1 %v489_v61  ;;  %v987_v60 = vld [vmem:[#allocation8 + $0x2e0] sm:$0xff]  ;;  %v924_v61 = vld [vmem:[#allocation8 + $0xe8] sm:$0xff] }
  0x9b   :  { %689 = vmatpush.msrb.mxu2 %v426_v62  ;;  %712 = vmatpush.msrb.mxu3 %v490_v63 }
  0x9c   :  { %644 = vmatpush.msrb.mxu0 %v421_v0  ;;  %667 = vmatpush.msrb.mxu1 %v485_v1  ;;  %v929_v0 = vld [vmem:[#allocation8 + $0x110] sm:$0xff] }
  0x9d   :  { %690 = vmatpush.msrb.mxu2 %v422_v2  ;;  %713 = vmatpush.msrb.mxu3 %v486_v3  ;;  %v985_v1 = vld [vmem:[#allocation8 + $0x2d0] sm:$0xff]  ;;  %v922_v2 = vld [vmem:[#allocation8 + $0xd8] sm:$0xff]  ;;  %v927_v3 = vld [vmem:[#allocation8 + $0x100] sm:$0xff] }
  0x9e   :  { %645 = vmatpush.msrb.mxu0 %v417_v4  ;;  %668 = vmatpush.msrb.mxu1 %v481_v5  ;;  %v983_v5 = vld [vmem:[#allocation8 + $0x2c0] sm:$0xff] }
  0x9f   :  { %691 = vmatpush.msrb.mxu2 %v418_v6  ;;  %714 = vmatpush.msrb.mxu3 %v482_v7  ;;  %v1021_v6 = vld [vmem:[#allocation8 + $0x3f0] sm:$0xff]  ;;  %v920_v7 = vld [vmem:[#allocation8 + $0xc8] sm:$0xff] }
  0xa0   :  { %646 = vmatpush.msrb.mxu0 %v413_v10  ;;  %669 = vmatpush.msrb.mxu1 %v477_v11  ;;  %v958_v11 = vld [vmem:[#allocation8 + $0x1f8] sm:$0xff] }
  0xa1   :  { %692 = vmatpush.msrb.mxu2 %v414_v12  ;;  %715 = vmatpush.msrb.mxu3 %v478_v13  ;;  %v981_v12 = vld [vmem:[#allocation8 + $0x2b0] sm:$0xff]  ;;  %v1019_v13 = vld [vmem:[#allocation8 + $0x3e0] sm:$0xff] }
  0xa2   :  { %647 = vmatmul.f32.vlgmr.msrb.gmra.mxu0 %v1469_v8  ;;  %670 = vmatmul.f32.vlgmr.msrb.gmra.mxu1 %v1471_v9 }
  0xa3   :  { %693 = vmatmul.f32.vlgmr.msrb.gmra.mxu2 %v1469_v8  ;;  %716 = vmatmul.f32.vlgmr.msrb.gmra.mxu3 %v1471_v9  ;;  %v917_v8 = vld [vmem:[#allocation8 + $0xb0] sm:$0xff]  ;;  %v955_v9 = vld [vmem:[#allocation8 + $0x1e0] sm:$0xff] }
  0xa4   :  { %1023 = vmatpush.msra.mxu0 %v925_v14  ;;  %1046 = vmatpush.msra.mxu1 %v957_v18  ;;  %v918_v14 = vld [vmem:[#allocation8 + $0xb8] sm:$0xff]  ;;  %v1017_v18 = vld [vmem:[#allocation8 + $0x3d0] sm:$0xff] }
  0xa5   :  { %1069 = vmatpush.msra.mxu2 %v989_v53  ;;  %1092 = vmatpush.msra.mxu3 %v1021_v6  ;;  %v1001_v6 = vld [vmem:[#allocation8 + $0x350] sm:$0xff] }
  0xa6   :  { %1024 = vmatpush.msra.mxu0 %v923_v15  ;;  %1047 = vmatpush.msra.mxu1 %v955_v9  ;;  %v956_v15 = vld [vmem:[#allocation8 + $0x1e8] sm:$0xff] }
  0xa7   :  { %1070 = vmatpush.msra.mxu2 %v987_v60  ;;  %1093 = vmatpush.msra.mxu3 %v1019_v13  ;;  %v965_v60 = vld [vmem:[#allocation8 + $0x230] sm:$0xff] }
  0xa8   :  { %1025 = vmatpush.msra.mxu0 %v921_v16  ;;  %1048 = vmatpush.msra.mxu1 %v953_v20  ;;  %v977_v20 = vld [vmem:[#allocation8 + $0x290] sm:$0xff] }
  0xa9   :  { %1071 = vmatpush.msra.mxu2 %v985_v1  ;;  %1094 = vmatpush.msra.mxu3 %v1017_v18 }
  0xaa   :  { %650 = vmatmul.f32.gmra.mxu0 %v1477_v54  ;;  %673 = vmatmul.f32.gmra.mxu1 %v1479_v55 }
  0xab   :  { %696 = vmatmul.f32.gmra.mxu2 %v1477_v54  ;;  %719 = vmatmul.f32.gmra.mxu3 %v1479_v55 }
  0xac   :  { %1026 = vmatpush.msra.mxu0 %v919_v17  ;;  %1049 = vmatpush.msra.mxu1 %v951_v22  ;;  %v979_v17 = vld [vmem:[#allocation8 + $0x2a0] sm:$0xff]  ;;  %v952_v22 = vld [vmem:[#allocation8 + $0x1c8] sm:$0xff] }
  0xad   :  { %1072 = vmatpush.msra.mxu2 %v983_v5  ;;  %v963_v5 = vld [vmem:[#allocation8 + $0x220] sm:$0xff] }
  0xae   :  { %1027 = vmatpush.msra.mxu0 %v917_v8  ;;  %1050 = vmatpush.msra.mxu1 %v949_v24  ;;  %v916_v8 = vld [vmem:[#allocation8 + $0xa8] sm:$0xff]  ;;  %v975_v24 = vld [vmem:[#allocation8 + $0x280] sm:$0xff] }
  0xaf   :  { %1073 = vmatpush.msra.mxu2 %v981_v12  ;;  %v938_v12 = vld [vmem:[#allocation8 + $0x158] sm:$0xff] }
  0xb0   :  { %1028 = vmatpush.msra.mxu0 %v915_v19  ;;  %1051 = vmatpush.msra.mxu1 %v947_v27  ;;  %v954_v19 = vld [vmem:[#allocation8 + $0x1d8] sm:$0xff]  ;;  %v912_v27 = vld [vmem:[#allocation8 + $0x88] sm:$0xff] }
  0xb1   :  { %1074 = vmatpush.msra.mxu2 %v979_v17  ;;  %v999_v17 = vld [vmem:[#allocation8 + $0x340] sm:$0xff] }
  0xb2   :  { %1029 = vmatpush.msra.mxu0 %v913_v21  ;;  %1052 = vmatpush.msra.mxu1 %v945_v31  ;;  %v1011_v31 = vld [vmem:[#allocation8 + $0x3a0] sm:$0xff] }
  0xb3   :  { %1075 = vmatpush.msra.mxu2 %v977_v20  ;;  %v898_v20 = vld [vmem:[#allocation8 + $0x18] sm:$0xff] }
  0xb4   :  { %1030 = vmatpush.msra.mxu0 %v911_v23  ;;  %1053 = vmatpush.msra.mxu1 %v943_v35 }
  0xb5   :  { %1076 = vmatpush.msra.mxu2 %v975_v24 }
  0xb6   :  { %1031 = vmatpush.msra.mxu0 %v909_v26  ;;  %1054 = vmatpush.msra.mxu1 %v941_v37  ;;  %v1013_v26 = vld [vmem:[#allocation8 + $0x3b0] sm:$0xff]  ;;  %v948_v37 = vld [vmem:[#allocation8 + $0x1a8] sm:$0xff] }
  0xb8   :  { %1032 = vmatpush.msra.mxu0 %v907_v30  ;;  %1055 = vmatpush.msra.mxu1 %v939_v40  ;;  %v973_v30 = vld [vmem:[#allocation8 + $0x270] sm:$0xff] }
  0xb9   :  { %1077 = vmatpush.msra.mxu2 %v973_v30  ;;  %v1009_v40 = vld [vmem:[#allocation8 + $0x390] sm:$0xff] }
  0xba   :  { %1033 = vmatpush.msra.mxu0 %v905_v34  ;;  %1056 = vmatpush.msra.mxu1 %v937_v42  ;;  %v946_v42 = vld [vmem:[#allocation8 + $0x198] sm:$0xff] }
  0xbc   :  { %v244_v54 = vpop.f32.mrf.mxu0  ;;  %v267_v55 = vpop.f32.mrf.mxu1  ;;  %1034 = vmatpush.msra.mxu0 %v903_v36  ;;  %1057 = vmatpush.msra.mxu1 %v935_v44  ;;  %v1007_v44 = vld [vmem:[#allocation8 + $0x380] sm:$0xff] }
  0xbd   :  { %v1509_v25 = vadd.f32 %v267_v55, %v244_v54  ;;  %v290_v28 = vpop.f32.mrf.mxu2  ;;  %v313_v29 = vpop.f32.mrf.mxu3  ;;  %v1015_v54 = vld [vmem:[#allocation8 + $0x3c0] sm:$0xff]  ;;  %v914_v55 = vld [vmem:[#allocation8 + $0x98] sm:$0xff] }
  0xbe   :  { %v1512_v33 = vadd.f32 %v313_v29, %v290_v28  ;;  %1035 = vmatpush.msra.mxu0 %v901_v39  ;;  %1058 = vmatpush.msra.mxu1 %v933_v50  ;;  %v950_v28 = vld [vmem:[#allocation8 + $0x1b8] sm:$0xff]  ;;  %v971_v39 = vld [vmem:[#allocation8 + $0x260] sm:$0xff] }
  0xbf   :  { %v1237_v32 = vmul.f32 -1.442695, %v1509_v25  ;;  %1095 = vmatpush.msra.mxu3 %v1015_v54  ;;  %1078 = vmatpush.msra.mxu2 %v971_v39  ;;  %v967_v50 = vld [vmem:[#allocation8 + $0x240] sm:$0xff]  ;;  %v936_v54 = vld [vmem:[#allocation8 + $0x148] sm:$0xff] }
  0xc0   :  { %v1238_v38 = vmul.f32 -1.442695, %v1512_v33  ;;  %1036 = vmatpush.msra.mxu0 %v899_v41  ;;  %1059 = vmatpush.msra.mxu1 %v931_v59  ;;  %v908_v41 = vld [vmem:[#allocation8 + $0x68] sm:$0xff] }
  0xc1   :  { %1256 = vpow2.f32 %v1237_v32  ;;  %1096 = vmatpush.msra.mxu3 %v1013_v26  ;;  %v910_v32 = vld [vmem:[#allocation8 + $0x78] sm:$0xff]  ;;  %v932_v39 = vld [vmem:[#allocation8 + $0x128] sm:$0xff] }
  0xc2   :  { %1258 = vpow2.f32 %v1238_v38  ;;  %1037 = vmatpush.msra.mxu0 %v897_v43  ;;  %1060 = vmatpush.msra.mxu1 %v929_v0  ;;  %v969_v43 = vld [vmem:[#allocation8 + $0x250] sm:$0xff] }
  0xc3   :  { %1097 = vmatpush.msra.mxu3 %v1011_v31  ;;  %1079 = vmatpush.msra.mxu2 %v969_v43 }
  0xc4   :  { %1038 = vmatpush.msra.mxu0 %v895_v49  ;;  %1061 = vmatpush.msra.mxu1 %v927_v3  ;;  %v944_v49 = vld [vmem:[#allocation8 + $0x188] sm:$0xff] }
  0xc5   :  { %1098 = vmatpush.msra.mxu3 %v1009_v40  ;;  %1080 = vmatpush.msra.mxu2 %v967_v50  ;;  %v940_v3 = vld [vmem:[#allocation8 + $0x168] sm:$0xff] }
  0xc6   :  { %1115 = vmatpush.msrb.mxu0 %v926_v56  ;;  %1138 = vmatpush.msrb.mxu1 %v958_v11  ;;  %v904_v56 = vld [vmem:[#allocation8 + $0x48] sm:$0xff] }
  0xc7   :  { %v1257_v45 = vpop.eup %1256  ;;  %1099 = vmatpush.msra.mxu3 %v1007_v44  ;;  %1081 = vmatpush.msra.mxu2 %v965_v60  ;;  %v900_v11 = vld [vmem:[#allocation8 + $0x28] sm:$0xff] }
  0xc8   :  { %v1517_v57 = vadd.f32 1.0, %v1257_v45  ;;  %v1259_v62 = vpop.eup %1258  ;;  %1116 = vmatpush.msrb.mxu0 %v924_v61  ;;  %1139 = vmatpush.msrb.mxu1 %v956_v15  ;;  %v1003_v61 = vld [vmem:[#allocation8 + $0x360] sm:$0xff] }
  0xc9   :  { %v1523_v4 = vadd.f32 1.0, %v1259_v62  ;;  %v902_v62 = vld [vmem:[#allocation8 + $0x38] sm:$0xff]  ;;  %1082 = vmatpush.msra.mxu2 %v963_v5 }
  0xca   :  { %1117 = vmatpush.msrb.mxu0 %v922_v2  ;;  %1140 = vmatpush.msrb.mxu1 %v954_v19  ;;  %vm760_vm0 = vweird.f32 %v1517_v57 }
  0xcb   :  { %vm775_vm3 = vweird.f32 %v1523_v4 }
  0xcc   :  { %1118 = vmatpush.msrb.mxu0 %v920_v7  ;;  %1141 = vmatpush.msrb.mxu1 %v952_v22  ;;  %v764_v7 = vand.u32 2147483647, %v1517_v57  ;;  %v959_v22 = vld [vmem:[#allocation8 + $0x200] sm:$0xff] }
  0xce   :  { %1119 = vmatpush.msrb.mxu0 %v918_v14  ;;  %1142 = vmatpush.msrb.mxu1 %v950_v28  ;;  %vm1564_vm4 = vcmp.eq.f32.partialorder %v764_v7, 8.507059e+37  ;;  %v934_v28 = vld [vmem:[#allocation8 + $0x138] sm:$0xff] }
  0xd0   :  { %1120 = vmatpush.msrb.mxu0 %v916_v8  ;;  %1143 = vmatpush.msrb.mxu1 %v948_v37  ;;  %v779_v37 = vand.u32 2147483647, %v1523_v4 }
  0xd2   :  { %1121 = vmatpush.msrb.mxu0 %v914_v55  ;;  %1144 = vmatpush.msrb.mxu1 %v946_v42  ;;  %vm1596_vm7 = vcmp.eq.f32.partialorder %v779_v37, 8.507059e+37  ;;  %v1014_v37 = vld [vmem:[#allocation8 + $0x3b8] sm:$0xff] }
  0xd4   :  { %v247_v46 = vpop.f32.mrf.mxu0  ;;  %v270_v47 = vpop.f32.mrf.mxu1  ;;  %1122 = vmatpush.msrb.mxu0 %v912_v27  ;;  %1145 = vmatpush.msrb.mxu1 %v944_v49  ;;  %v896_v27 = vld [vmem:[#allocation8 + $0x8] sm:$0xff] }
  0xd5   :  { %v1515_v48 = vadd.f32 %v270_v47, %v247_v46  ;;  %v293_v51 = vpop.f32.mrf.mxu2  ;;  %v316_v52 = vpop.f32.mrf.mxu3  ;;  %v906_v47 = vld [vmem:[#allocation8 + $0x58] sm:$0xff] }
  0xd6   :  { %v1520_v63 = vadd.f32 %v316_v52, %v293_v51  ;;  %1123 = vmatpush.msrb.mxu0 %v910_v32  ;;  %v1005_v51 = vld [vmem:[#allocation8 + $0x370] sm:$0xff] }
  0xd7   :  { %v1241_v58 = vmul.f32 -1.442695, %v1515_v48  ;;  %1100 = vmatpush.msra.mxu3 %v1005_v51 }
  0xd8   :  { %v1242_v10 = vmul.f32 -1.442695, %v1520_v63  ;;  %1124 = vmatpush.msrb.mxu0 %v908_v41  ;;  %v993_v41 = vld [vmem:[#allocation8 + $0x310] sm:$0xff] }
  0xd9   :  { %1260 = vpow2.f32 %v1241_v58  ;;  %v942_v58 = vld [vmem:[#allocation8 + $0x178] sm:$0xff]  ;;  %1101 = vmatpush.msra.mxu3 %v1003_v61  ;;  %v928_v61 = vld [vmem:[#allocation8 + $0x108] sm:$0xff] }
  0xda   :  { %1262 = vrcp.f32 %v1517_v57  ;;  %1125 = vmatpush.msrb.mxu0 %v906_v47  ;;  %1146 = vmatpush.msrb.mxu1 %v942_v58  ;;  %v930_v47 = vld [vmem:[#allocation8 + $0x118] sm:$0xff] }
  0xdb   :  { %1264 = vrcp.f32 %v1523_v4  ;;  %1102 = vmatpush.msra.mxu3 %v1001_v6 }
  0xdc   :  { %1266 = vpow2.f32 %v1242_v10  ;;  %1126 = vmatpush.msrb.mxu0 %v904_v56  ;;  %v766_v10 = vand.u32 2147483648, %v1517_v57  ;;  %1147 = vmatpush.msrb.mxu1 %v940_v3  ;;  %v991_v56 = vld [vmem:[#allocation8 + $0x300] sm:$0xff]  ;;  %v984_v3 = vld [vmem:[#allocation8 + $0x2c8] sm:$0xff] }
  0xdd   :  { %1103 = vmatpush.msra.mxu3 %v999_v17 }
  0xde   :  { %v336_v35 = vpop.f32.mrf.mxu0  ;;  %v359_v36 = vpop.f32.mrf.mxu1  ;;  %1127 = vmatpush.msrb.mxu0 %v902_v62  ;;  %1148 = vmatpush.msrb.mxu1 %v938_v12  ;;  %v767_v24 = vor.u32 1.1754944e-38, %v766_v10  ;;  %v1022_v62 = vld [vmem:[#allocation8 + $0x3f8] sm:$0xff] }
  0xdf   :  { %v1261_v16 = vpop.eup %1260  ;;  %v1541_v53 = vadd.f32 %v359_v36, %v336_v35  ;;  %v382_v1 = vpop.f32.mrf.mxu2  ;;  %v990_v35 = vld [vmem:[#allocation8 + $0x2f8] sm:$0xff]  ;;  %v995_v36 = vld [vmem:[#allocation8 + $0x320] sm:$0xff] }
  0xe0   :  { %v1527_v9 = vpop.eup %1262  ;;  %v1529_v21 = vadd.f32 1.0, %v1261_v16  ;;  %v405_v2 = vpop.f32.mrf.mxu3  ;;  %v961_v16 = vld [vmem:[#allocation8 + $0x210] sm:$0xff]  ;;  %1128 = vmatpush.msrb.mxu0 %v900_v11  ;;  %1149 = vmatpush.msrb.mxu1 %v936_v54  ;;  %v1018_v54 = vld [vmem:[#allocation8 + $0x3d8] sm:$0xff] }
  0xe1   :  { %v756_v23 = vmul.f32 %v1527_v9, %v1517_v57  ;;  %v1533_v29 = vpop.eup %1264  ;;  %vm761_vm1 = vweird.f32 %v1527_v9  ;;  %v1239_v15 = vmul.f32 -1.442695, %v1541_v53  ;;  %v1569_v26 = vadd.f32 %v405_v2, %v382_v1  ;;  %1083 = vmatpush.msra.mxu2 %v961_v16  ;;  %v978_v57 = vld [vmem:[#allocation8 + $0x298] sm:$0xff] }
  0xe2   :  { %v1267_v34 = vpop.eup %1266  ;;  %1268 = vrcp.f32 %v1529_v21  ;;  %v771_v45 = vmul.f32 %v1533_v29, %v1523_v4  ;;  %vm1558_vm2 = vmor %vm760_vm0, %vm761_vm1  ;;  %vm776_vm5 = vweird.f32 %v1533_v29  ;;  %1129 = vmatpush.msrb.mxu0 %v898_v20  ;;  %1150 = vmatpush.msrb.mxu1 %v934_v28  ;;  %vm820_vm8 = vweird.f32 %v1529_v21 }
  0xe3   :  { %v757_v38 = vsub.f32 1.0, %v756_v23  ;;  %v1538_v46 = vadd.f32 1.0, %v1267_v34  ;;  %v997_v23 = vld [vmem:[#allocation8 + $0x330] sm:$0xff]  ;;  %1084 = vmatpush.msra.mxu2 %v959_v22  ;;  %vm1587_vm6 = vmor %vm775_vm3, %vm776_vm5  ;;  %v826_v5 = vand.u32 2147483648, %v1529_v21  ;;  %v996_v22 = vld [vmem:[#allocation8 + $0x328] sm:$0xff] }
  0xe4   :  { %v772_v0 = vsub.f32 1.0, %v771_v45  ;;  %1104 = vmatpush.msra.mxu3 %v997_v23  ;;  %1130 = vmatpush.msrb.mxu0 %v896_v27  ;;  %v1240_v45 = vmul.f32 -1.442695, %v1569_v26 }
  0xe5   :  { %v758_v52 = vmul.f32 %v1527_v9, %v757_v38  ;;  %1270 = vrcp.f32 %v1538_v46  ;;  %v781_v38 = vand.u32 2147483648, %v1523_v4  ;;  %1161 = vmatpush.msrb.mxu2 %v990_v35  ;;  %1151 = vmatpush.msrb.mxu1 %v932_v39  ;;  %v986_v4 = vld [vmem:[#allocation8 + $0x2d8] sm:$0xff]  ;;  %vm835_vm12 = vweird.f32 %v1538_v46 }
  0xe6   :  { %v773_v55 = vmul.f32 %v1533_v29, %v772_v0  ;;  %1272 = vpow2.f32 %v1239_v15  ;;  %1105 = vmatpush.msra.mxu3 %v995_v36  ;;  %v839_v28 = vand.u32 2147483647, %v1538_v46  ;;  %v976_v36 = vld [vmem:[#allocation8 + $0x288] sm:$0xff] }
  0xe7   :  { %v759_v13 = vadd.f32 %v1527_v9, %v758_v52  ;;  %v782_v60 = vor.u32 1.1754944e-38, %v781_v38  ;;  %1152 = vmatpush.msrb.mxu1 %v930_v47  ;;  %1274 = vpow2.f32 %v1240_v45  ;;  %v974_v45 = vld [vmem:[#allocation8 + $0x278] sm:$0xff]  ;;  %v1012_v47 = vld [vmem:[#allocation8 + $0x3a8] sm:$0xff] }
  0xe8   :  { %v1543_v59 = vpop.eup %1268  ;;  %v339_v8 = vpop.f32.mrf.mxu0  ;;  %v774_v40 = vadd.f32 %v1533_v29, %v773_v55  ;;  %1106 = vmatpush.msra.mxu3 %v993_v41  ;;  %vm840_vm15 = vcmp.eq.f32.partialorder %v839_v28, 8.507059e+37  ;;  %v964_v15 = vld [vmem:[#allocation8 + $0x228] sm:$0xff] }
  0xe9   :  { %v816_v14 = vmul.f32 %v1543_v59, %v1529_v21  ;;  %v362_v19 = vpop.f32.mrf.mxu1  ;;  %v763_v31 = vsel %vm1558_vm2, %v1527_v9, %v759_v13  ;;  %v988_v9 = vld [vmem:[#allocation8 + $0x2e8] sm:$0xff]  ;;  %v385_v51 = vpop.f32.mrf.mxu2  ;;  %vm821_vm9 = vweird.f32 %v1543_v59  ;;  %1153 = vmatpush.msrb.mxu1 %v928_v61 }
  0xea   :  { %v1576_v34 = vadd.f32 %v362_v19, %v339_v8  ;;  %v768_v42 = vsel %vm1564_vm4, %v767_v24, %v763_v31  ;;  %v408_v52 = vpop.f32.mrf.mxu3  ;;  %1162 = vmatpush.msrb.mxu2 %v988_v9  ;;  %v778_v2 = vsel %vm1587_vm6, %v1533_v29, %v774_v40  ;;  %1107 = vmatpush.msra.mxu3 %v991_v56  ;;  %v824_v29 = vand.u32 2147483647, %v1529_v21  ;;  %vm1615_vm10 = vmor %vm820_vm8, %vm821_vm9  ;;  %v980_v21 = vld [vmem:[#allocation8 + $0x2a8] sm:$0xff]  ;;  %v1010_v56 = vld [vmem:[#allocation8 + $0x398] sm:$0xff] }
  0xeb   :  { %v1571_v30 = vpop.eup %1270  ;;  %v817_v32 = vsub.f32 1.0, %v816_v14  ;;  %v875_v1 = vmul.f32 %v768_v42, %v1509_v25  ;;  %v1607_v7 = vadd.f32 %v408_v52, %v385_v51  ;;  %v1020_v25 = vld [vmem:[#allocation8 + $0x3e8] sm:$0xff]  ;;  %v982_v14 = vld [vmem:[#allocation8 + $0x2b8] sm:$0xff]  ;;  %v783_v18 = vsel %vm1596_vm7, %v782_v60, %v778_v2 }
  0xec   :  { %v831_v44 = vmul.f32 %v1571_v30, %v1538_v46  ;;  %v1243_v50 = vmul.f32 -1.442695, %v1576_v34  ;;  %v1273_v0 = vpop.eup %1272  ;;  %1163 = vmatpush.msrb.mxu2 %v986_v4  ;;  %1184 = vmatpush.msrb.mxu3 %v1022_v62  ;;  %v827_v8 = vor.u32 1.1754944e-38, %v826_v5  ;;  %vm1630_vm11 = vcmp.eq.f32.partialorder %v824_v29, 8.507059e+37  ;;  %v1016_v24 = vld [vmem:[#allocation8 + $0x3c8] sm:$0xff]  ;;  %v970_v60 = vld [vmem:[#allocation8 + $0x258] sm:$0xff] }
  0xed   :  { %v818_v49 = vmul.f32 %v1543_v59, %v817_v32  ;;  %v1619_v16 = vadd.f32 1.0, %v1273_v0  ;;  %v1244_v20 = vmul.f32 -1.442695, %v1607_v7  ;;  %v1275_v23 = vpop.eup %1274  ;;  %vm836_vm13 = vweird.f32 %v1571_v30  ;;  %v972_v4 = vld [vmem:[#allocation8 + $0x268] sm:$0xff] }
  0xee   :  { %v832_v6 = vsub.f32 1.0, %v831_v44  ;;  %1276 = vpow2.f32 %v1243_v50  ;;  %1164 = vmatpush.msrb.mxu2 %v984_v3  ;;  %1185 = vmatpush.msrb.mxu3 %v1020_v25  ;;  %v841_v31 = vand.u32 2147483648, %v1538_v46  ;;  %vm1648_vm14 = vmor %vm835_vm12, %vm836_vm13  ;;  %v1652_v9 = vadd.f32 1.0, %v1275_v23  ;;  %v1008_v61 = vld [vmem:[#allocation8 + $0x388] sm:$0xff] }
  0xef   :  { %v819_v12 = vadd.f32 %v1543_v59, %v818_v49  ;;  %1278 = vrcp.f32 %v1619_v16  ;;  %v968_v0 = vld [vmem:[#allocation8 + $0x248] sm:$0xff]  ;;  %vm790_vm0 = vweird.f32 %v1619_v16  ;;  %v796_v23 = vand.u32 2147483648, %v1619_v16 }
  0xf0   :  { %v833_v19 = vmul.f32 %v1571_v30, %v832_v6  ;;  %1165 = vmatpush.msrb.mxu2 %v982_v14  ;;  %1186 = vmatpush.msrb.mxu3 %v1018_v54  ;;  %1280 = vpow2.f32 %v1244_v20  ;;  %v842_v50 = vor.u32 1.1754944e-38, %v841_v31  ;;  %v1004_v25 = vld [vmem:[#allocation8 + $0x368] sm:$0xff]  ;;  %vm805_vm4 = vweird.f32 %v1652_v9 }
  0xf1   :  { %v823_v55 = vsel %vm1615_vm10, %v1543_v59, %v819_v12  ;;  %v876_v59 = vmul.f32 %v783_v18, %v1512_v33  ;;  %1282 = vrcp.f32 %v1652_v9  ;;  %v1002_v18 = vld [vmem:[#allocation8 + $0x358] sm:$0xff]  ;;  %v960_v54 = vld [vmem:[#allocation8 + $0x208] sm:$0xff] }
  0xf2   :  { %1166 = vmatpush.msrb.mxu2 %v980_v21  ;;  %1187 = vmatpush.msrb.mxu3 %v1016_v24  ;;  %v828_v38 = vsel %vm1630_vm11, %v827_v8, %v823_v55  ;;  %v834_v39 = vadd.f32 %v1571_v30, %v833_v19  ;;  %v962_v8 = vld [vmem:[#allocation8 + $0x218] sm:$0xff] }
  0xf3   :  { %v879_v49 = vmul.f32 %v828_v38, %v1515_v48  ;;  %v998_v55 = vld [vmem:[#allocation8 + $0x338] sm:$0xff] }
  0xf4   :  { %v1277_v27 = vpop.eup %1276  ;;  %1167 = vmatpush.msrb.mxu2 %v978_v57  ;;  %1188 = vmatpush.msrb.mxu3 %v1014_v37  ;;  %v838_v52 = vsel %vm1648_vm14, %v1571_v30, %v834_v39  ;;  %v994_v24 = vld [vmem:[#allocation8 + $0x318] sm:$0xff]  ;;  %v809_v39 = vand.u32 2147483647, %v1652_v9 }
  0xf5   :  { %v1654_v41 = vadd.f32 1.0, %v1277_v27  ;;  %v1659_v51 = vpop.eup %1278  ;;  %v843_v62 = vsel %vm840_vm15, %v842_v50, %v838_v52 }
  0xf6   :  { %1168 = vmatpush.msrb.mxu2 %v976_v36  ;;  %1189 = vmatpush.msrb.mxu3 %v1012_v47  ;;  %v1281_v48 = vpop.eup %1280  ;;  %v786_v30 = vmul.f32 %v1659_v51, %v1619_v16  ;;  %v880_v6 = vmul.f32 %v843_v62, %v1520_v63  ;;  %v1000_v63 = vld [vmem:[#allocation8 + $0x348] sm:$0xff]  ;;  %vm791_vm1 = vweird.f32 %v1659_v51  ;;  %vm810_vm10 = vcmp.eq.f32.partialorder %v809_v39, 8.507059e+37 }
  0xf7   :  { %1284 = vrcp.f32 %v1654_v41  ;;  %v1672_v2 = vadd.f32 1.0, %v1281_v48  ;;  %v1675_v12 = vpop.eup %1282  ;;  %vm1696_vm2 = vmor %vm790_vm0, %vm791_vm1  ;;  %vm850_vm6 = vweird.f32 %v1654_v41 }
  0xf8   :  { %1169 = vmatpush.msrb.mxu2 %v974_v45  ;;  %1190 = vmatpush.msrb.mxu3 %v1010_v56  ;;  %v787_v29 = vsub.f32 1.0, %v786_v30  ;;  %v801_v19 = vmul.f32 %v1675_v12, %v1652_v9  ;;  %vm806_vm5 = vweird.f32 %v1675_v12 }
  0xf9   :  { %1286 = vrcp.f32 %v1672_v2  ;;  %vm1717_vm8 = vmor %vm805_vm4, %vm806_vm5  ;;  %vm865_vm12 = vweird.f32 %v1672_v2 }
  0xfa   :  { %1170 = vmatpush.msrb.mxu2 %v972_v4  ;;  %1191 = vmatpush.msrb.mxu3 %v1008_v61  ;;  %v788_v20 = vmul.f32 %v1659_v51, %v787_v29  ;;  %v802_v57 = vsub.f32 1.0, %v801_v19  ;;  %v871_v61 = vand.u32 2147483648, %v1672_v2 }
  0xfb   :  { %v556_v10 = vpop.f32.mrf.mxu0  ;;  %v579_v11 = vpop.f32.mrf.mxu1 }
  0xfc   :  { %v580_v13 = vadd.f32 %v579_v11, %v556_v10  ;;  %1171 = vmatpush.msrb.mxu2 %v970_v60  ;;  %v966_v11 = vld [vmem:[#allocation8 + $0x238] sm:$0xff]  ;;  %v803_v36 = vmul.f32 %v1675_v12, %v802_v57  ;;  %v872_v29 = vor.u32 1.1754944e-38, %v871_v61 }
  0xfe   :  { %v1621_v17 = vmul.f32 %v875_v1, %v580_v13  ;;  %v1006_v1 = vld [vmem:[#allocation8 + $0x378] sm:$0xff]  ;;  %1172 = vmatpush.msrb.mxu2 %v968_v0  ;;  %v1677_v13 = vpop.eup %1284  ;;  %v869_v0 = vand.u32 2147483647, %v1672_v2 }
  0xff   :  { %1192 = vmatpush.msrb.mxu3 %v1006_v1  ;;  %v846_v21 = vmul.f32 %v1677_v13, %v1654_v41  ;;  %v1692_v27 = vpop.eup %1286  ;;  %vm851_vm7 = vweird.f32 %v1677_v13 }
 0x100   :  { %1039 = vmatmul.f32.vlgmr.msra.gmra.mxu0 %v1621_v17  ;;  %1173 = vmatpush.msrb.mxu2 %v966_v11  ;;  %v861_v37 = vmul.f32 %v1692_v27, %v1672_v2  ;;  %vm1723_vm9 = vmor %vm850_vm6, %vm851_vm7  ;;  %vm866_vm13 = vweird.f32 %v1692_v27  ;;  %vm870_vm15 = vcmp.eq.f32.partialorder %v869_v0, 8.507059e+37 }
 0x101   :  { %1193 = vmatpush.msrb.mxu3 %v1004_v25  ;;  %v847_v28 = vsub.f32 1.0, %v846_v21  ;;  %vm1741_vm14 = vmor %vm865_vm12, %vm866_vm13 }
 0x102   :  { %v602_v32 = vpop.f32.mrf.mxu2  ;;  %v625_v35 = vpop.f32.mrf.mxu3  ;;  %1174 = vmatpush.msrb.mxu2 %v964_v15 }
 0x103   :  { %v626_v40 = vadd.f32 %v625_v35, %v602_v32  ;;  %1194 = vmatpush.msrb.mxu3 %v1002_v18  ;;  %v992_v32 = vld [vmem:[#allocation8 + $0x308] sm:$0xff]  ;;  %v797_v35 = vor.u32 1.1754944e-38, %v796_v23  ;;  %v848_v38 = vmul.f32 %v1677_v13, %v847_v28 }
 0x104   :  { %1175 = vmatpush.msrb.mxu2 %v962_v8 }
 0x105   :  { %v1656_v42 = vmul.f32 %v876_v59, %v626_v40  ;;  %v559_v43 = vpop.f32.mrf.mxu0  ;;  %v582_v44 = vpop.f32.mrf.mxu1  ;;  %1195 = vmatpush.msrb.mxu3 %v1000_v63  ;;  %v789_v59 = vadd.f32 %v1659_v51, %v788_v20  ;;  %v811_v40 = vand.u32 2147483648, %v1652_v9  ;;  %v849_v47 = vadd.f32 %v1677_v13, %v848_v38 }
 0x106   :  { %v583_v46 = vadd.f32 %v582_v44, %v559_v43  ;;  %1176 = vmatpush.msrb.mxu2 %v960_v54  ;;  %v856_v43 = vand.u32 2147483648, %v1654_v41  ;;  %v862_v44 = vsub.f32 1.0, %v861_v37 }
 0x107   :  { %1062 = vmatmul.f32.vlgmr.msra.gmra.mxu1 %v1656_v42  ;;  %1196 = vmatpush.msrb.mxu3 %v998_v55  ;;  %v812_v52 = vor.u32 1.1754944e-38, %v811_v40 }
 0x108   :  { %v1666_v58 = vmul.f32 %v879_v49, %v583_v46  ;;  %v854_v49 = vand.u32 2147483647, %v1654_v41  ;;  %v863_v48 = vmul.f32 %v1692_v27, %v862_v44  ;;  %v853_v41 = vsel %vm1723_vm9, %v1677_v13, %v849_v47 }
 0x109   :  { %1197 = vmatpush.msrb.mxu3 %v996_v22 }
 0x10a   :  { %1042 = vmatmul.f32.gmra.mxu0 %v1666_v58  ;;  %vm855_vm11 = vcmp.eq.f32.partialorder %v854_v49, 8.507059e+37  ;;  %v864_v30 = vadd.f32 %v1692_v27, %v863_v48 }
 0x10b   :  { %1198 = vmatpush.msrb.mxu3 %v994_v24 }
 0x10c   :  { %v605_v3 = vpop.f32.mrf.mxu2  ;;  %v628_v5 = vpop.f32.mrf.mxu3 }
 0x10d   :  { %v629_v10 = vadd.f32 %v628_v5, %v605_v3  ;;  %1199 = vmatpush.msrb.mxu3 %v992_v32 }
 0x10f   :  { %v1679_v14 = vmul.f32 %v880_v6, %v629_v10 }
 0x111   :  { %1065 = vmatmul.f32.gmra.mxu1 %v1679_v14 }
 0x112   :  { %1131 = vmatmul.f32.vlgmr.msrb.gmra.mxu0 %v1621_v17  ;;  %v794_v17 = vand.u32 2147483647, %v1619_v16  ;;  %v793_v16 = vsel %vm1696_vm2, %v1659_v51, %v789_v59 }
 0x114   :  { %vm795_vm3 = vcmp.eq.f32.partialorder %v794_v17, 8.507059e+37 }
 0x115   :  { %v798_v33 = vsel %vm795_vm3, %v797_v35, %v793_v16 }
 0x116   :  { %v877_v51 = vmul.f32 %v798_v33, %v1541_v53 }
 0x119   :  { %1154 = vmatmul.f32.vlgmr.msrb.gmra.mxu1 %v1656_v42  ;;  %v804_v42 = vadd.f32 %v1675_v12, %v803_v36 }
 0x11a   :  { %1134 = vmatmul.f32.gmra.mxu0 %v1666_v58  ;;  %v857_v58 = vor.u32 1.1754944e-38, %v856_v43 }
 0x11b   :  { %v808_v56 = vsel %vm1717_vm8, %v1675_v12, %v804_v42 }
 0x11c   :  { %v813_v53 = vsel %vm810_vm10, %v812_v52, %v808_v56  ;;  %v858_v62 = vsel %vm855_vm11, %v857_v58, %v853_v41 }
 0x11d   :  { %v878_v6 = vmul.f32 %v813_v53, %v1569_v26  ;;  %v881_v12 = vmul.f32 %v858_v62, %v1576_v34 }
 0x11f   :  { %v648_v50 = vpop.f32.mrf.mxu0  ;;  %v671_v46 = vpop.f32.mrf.mxu1 }
 0x120   :  { %v672_v4 = vadd.f32 %v671_v46, %v648_v50 }
 0x121   :  { %1157 = vmatmul.f32.gmra.mxu1 %v1679_v14  ;;  %v868_v14 = vsel %vm1741_vm14, %v1692_v27, %v864_v30 }
 0x122   :  { %v885_v60 = vmul.f32 %v877_v51, %v672_v4  ;;  %v873_v18 = vsel %vm870_vm15, %v872_v29, %v868_v14 }
 0x123   :  { %v882_v26 = vmul.f32 %v873_v18, %v1607_v7 }
 0x124   :  { %1085 = vmatmul.f32.vlgmr.msra.gmra.mxu2 %v885_v60 }
 0x126   :  { %v694_v3 = vpop.f32.mrf.mxu2  ;;  %v717_v5 = vpop.f32.mrf.mxu3 }
 0x127   :  { %v718_v10 = vadd.f32 %v717_v5, %v694_v3  ;;  %v651_v11 = vpop.f32.mrf.mxu0  ;;  %v674_v25 = vpop.f32.mrf.mxu1 }
 0x128   :  { %v675_v13 = vadd.f32 %v674_v25, %v651_v11 }
 0x129   :  { %v886_v2 = vmul.f32 %v878_v6, %v718_v10 }
 0x12a   :  { %v889_v15 = vmul.f32 %v881_v12, %v675_v13 }
 0x12b   :  { %1108 = vmatmul.f32.vlgmr.msra.gmra.mxu3 %v886_v2 }
 0x12c   :  { %1088 = vmatmul.f32.gmra.mxu2 %v889_v15 }
 0x12e   :  { %v697_v8 = vpop.f32.mrf.mxu2  ;;  %v720_v63 = vpop.f32.mrf.mxu3 }
 0x12f   :  { %v721_v19 = vadd.f32 %v720_v63, %v697_v8 }
 0x131   :  { %v890_v20 = vmul.f32 %v882_v26, %v721_v19 }
 0x133   :  { %1111 = vmatmul.f32.gmra.mxu3 %v890_v20 }
 0x134   :  { %1177 = vmatmul.f32.vlgmr.msrb.gmra.mxu2 %v885_v60 }
 0x13b   :  { %1200 = vmatmul.f32.vlgmr.msrb.gmra.mxu3 %v886_v2 }
 0x13c   :  { %1180 = vmatmul.f32.gmra.mxu2 %v889_v15 }
 0x143   :  { %1203 = vmatmul.f32.gmra.mxu3 %v890_v20 }
 0x17d   :  { %v1040_v21 = vpop.f32.mrf.mxu0 }
 0x184   :  { %v1063_v34 = vpop.f32.mrf.mxu1 }
 0x185   :  { %v1064_v55 = vadd.f32 %v1063_v34, %v1040_v21 }
 0x187   :  { %v1043_v57 = vpop.f32.mrf.mxu0 }
 0x18e   :  { %v1066_v22 = vpop.f32.mrf.mxu1 }
 0x18f   :  { %v1067_v17 = vadd.f32 %v1066_v22, %v1043_v57  ;;  %v1132_v35 = vpop.f32.mrf.mxu0 }
 0x196   :  { %v1155_v28 = vpop.f32.mrf.mxu1 }
 0x197   :  { %v1156_v37 = vadd.f32 %v1155_v28, %v1132_v35  ;;  %v1135_v33 = vpop.f32.mrf.mxu0 }
 0x19e   :  { %v1158_v40 = vpop.f32.mrf.mxu1 }
 0x19f   :  { %v1159_v43 = vadd.f32 %v1158_v40, %v1135_v33 }
 0x1a7   :  { %v1086_v54 = vpop.f32.mrf.mxu2 }
 0x1a8   :  { %v1087_v23 = vadd.f32 %v1086_v54, %v1064_v55 }
 0x1ae   :  { %v1109_v24 = vpop.f32.mrf.mxu3 }
 0x1af   :  { %v1110_v27 = vadd.f32 %v1109_v24, %v1087_v23  ;;  %v1089_v59 = vpop.f32.mrf.mxu2 }
 0x1b0   :  { %v1090_v7 = vadd.f32 %v1089_v59, %v1067_v17 }
 0x1b1   :  { %1211 = vst [vmem:[#allocation10] sm:$0xff] %v1110_v27 }
 0x1b6   :  { %v1112_v31 = vpop.f32.mrf.mxu3 }
 0x1b7   :  { %v1113_v32 = vadd.f32 %v1112_v31, %v1090_v7  ;;  %v1178_v36 = vpop.f32.mrf.mxu2 }
 0x1b8   :  { %v1179_v16 = vadd.f32 %v1178_v36, %v1156_v37 }
 0x1b9   :  { %1213 = vst [vmem:[#allocation10 + $0x10] sm:$0xff] %v1113_v32 }
 0x1be   :  { %v1201_v38 = vpop.f32.mrf.mxu3 }
 0x1bf   :  { %v1202_v39 = vadd.f32 %v1201_v38, %v1179_v16  ;;  %v1181_v42 = vpop.f32.mrf.mxu2 }
 0x1c0   :  { %v1182_v44 = vadd.f32 %v1181_v42, %v1159_v43 }
 0x1c1   :  { %1212 = vst [vmem:[#allocation10 + $0x8] sm:$0xff] %v1202_v39 }
 0x1c6   :  { %v1204_v45 = vpop.f32.mrf.mxu3 }
 0x1c7   :  { %v1205_v47 = vadd.f32 %v1204_v45, %v1182_v44 }
 0x1c9   :  { %1214 = vst [vmem:[#allocation10 + $0x18] sm:$0xff] %v1205_v47 }
 0x1ca   :  { %1227 = dma.vmem_to_hbm [thread:$0]  %s1220_s3, 512, %s1222_s15, [#allocation4], %s1421_s30, %s1421_s30, %s1422_s5  }
 0x1cb   :  { %1414 = dma.done.wait [#allocation4], 512  }
 0x1cc   :  { %1415 = vsyncadd [#allocation4], 4294966784 }
 0x1cd   :  { %1232 = vsyncpa [#allocation3], 1 }
 0x1ce   :  { %1233 = vsyncpa [#allocation6], 1 }
 0x1cf   :  { %1234 = vsyncpa [#allocation9], 1 }
 0x1d0   :  { %1235 = vsyncpa [#allocation4], 1 }

</bundles_post_ra>
